<compile_context>
chip_gen: v5e
topology: v5e:2x2
jax: 0.10.0
libtpu: 0.0.40
codegen_flags: <defaults>
</compile_context>

<pallas_src>
import functools

import jax
import jax.numpy as jnp
from jax.experimental import pallas as pl
from jax.experimental.pallas import tpu as pltpu


_VMEM = pl.BlockSpec(memory_space=pltpu.MemorySpace.VMEM)


def _round_up(x, m):
    return ((x + m - 1) // m) * m


# ----------------------------------------------------------------------------
# Single fused Pallas kernel: whole model forward
# ----------------------------------------------------------------------------
def _fused_model_kernel(idx_ref, xu_ref, xi_ref, w_ref, vec_ref, out_ref, *, hidden):
    f32 = jnp.float32
    H = hidden
    nu = xu_ref.shape[0]
    ni = xi_ref.shape[0]
    width = idx_ref.shape[1]      # padded edge / label lane width (multiple of 128)
    r_in = xu_ref.shape[1]        # padded input-feature rows of the weight slab

    idx = idx_ref[...]            # (8, width) int32; pad entries are -1 (never match a node)

    # ---------------- adjacency with duplicate-edge multiplicity -------------
    # adj[dst, src] = number of edges src -> dst  (matches PyG edge-level softmax exactly)
    def build_adj(src_row, dst_row, n_src, n_dst):
        iota_src = jax.lax.broadcasted_iota(jnp.int32, (n_src, width), 0)
        iota_dst = jax.lax.broadcasted_iota(jnp.int32, (n_dst, width), 0)
        src_oh = (src_row == iota_src).astype(jnp.bfloat16)   # exact 0/1 in bf16
        dst_oh = (dst_row == iota_dst).astype(jnp.bfloat16)
        return jax.lax.dot_general(dst_oh, src_oh, (((1,), (1,)), ((), ())),
                                   preferred_element_type=f32)  # (n_dst, n_src)

    adj_item = build_adj(idx[0:1, :], idx[1:2, :], nu, ni)   # (Ni, Nu)
    adj_user = build_adj(idx[2:3, :], idx[3:4, :], ni, nu)   # (Nu, Ni)

    # ---------------- unpack parameter slabs (static slices, free) -----------
    w1 = w_ref[0:r_in, 0:4 * H]          # layer-1 [Wl_a | Wr_a | Wl_b | Wr_b]
    w2 = w_ref[0:H, 4 * H:8 * H]         # layer-2 [Wl_a | Wr_a | Wl_b | Wr_b]
    dw1u = w_ref[0:H, 8 * H:9 * H]       # decoder W1 (user half)
    dw1i = w_ref[0:H, 9 * H:10 * H]      # decoder W1 (item half)

    vec = vec_ref[...]
    pb1 = vec[0:1, 0:4 * H]              # layer-1 proj biases [b_l_a|b_r_a|b_l_b|b_r_b]
    pb2 = vec[1:2, 0:4 * H]              # layer-2 proj biases
    att_row = vec[2:3, 0:4 * H]          # [att1_a | att1_b | att2_a | att2_b]
    ob_row = vec[3:4, 0:4 * H]           # conv output biases, same layout as att_row
    db1 = vec[4:5, 0:H]                  # decoder lin1 bias
    w2t = vec[4:5, H:2 * H]              # decoder lin2 weight, transposed (1, H)
    db2 = vec[4:5, 2 * H:2 * H + 1]      # decoder lin2 bias (1, 1)

    # ---------------- GATv2Conv (heads=1, add_self_loops=False) --------------
    def gatv2(xl, xr, att, bias, adj, apply_relu):
        # e[i,j] = att . LeakyReLU(xr_i + xl_j), slope 0.2
        # LeakyReLU(s) = 0.6*s + 0.4*|s|;  att pre-folded into xl/xr so the rank-3 term
        # only needs |xl'+xr'| reduced with sign(att).
        att_sgn = jnp.where(att >= 0.0, 1.0, -1.0)            # (1, H)
        xl_s = xl * att                                        # (Ns, H)
        xr_s = xr * att                                        # (Nd, H)
        ar = jnp.sum(xr_s, axis=-1, keepdims=True)             # (Nd, 1) = att.xr_i
        al = jax.lax.dot_general(att, xl, (((1,), (1,)), ((), ())),
                                 preferred_element_type=f32)   # (1, Ns) = att.xl_j
        s = xr_s[:, None, :] + xl_s[None, :, :]                # (Nd, Ns, H)
        e_abs = jnp.sum(jnp.abs(s) * att_sgn[None, :, :], axis=-1)  # (Nd, Ns)
        e = 0.6 * (ar + al) + 0.4 * e_abs

        # masked softmax over incoming edges (duplicates weighted by multiplicity via adj)
        e = jnp.where(adj > 0.0, e, f32(-1e30))
        m = jnp.max(e, axis=-1, keepdims=True)
        p = jnp.exp(e - m) * adj
        denom = jnp.sum(p, axis=-1, keepdims=True)
        alpha = p / jnp.where(denom > 0.0, denom, 1.0)         # isolated nodes -> 0 agg

        out = jnp.dot(alpha, xl, preferred_element_type=f32) + bias
        return jnp.maximum(out, 0.0) if apply_relu else out

    xu = xu_ref[...]
    xi = xi_ref[...]

    # encoder layer 1: one 128-lane projection matmul per node type (+ fused proj bias, ReLU)
    pu1 = jnp.dot(xu, w1, preferred_element_type=f32) + pb1    # (Nu, 4H)
    pi1 = jnp.dot(xi, w1, preferred_element_type=f32) + pb1    # (Ni, 4H)
    h_item = gatv2(pu1[:, 0:H], pi1[:, H:2 * H],
                   att_row[:, 0:H], ob_row[:, 0:H], adj_item, True)        # (Ni, H)
    h_user = gatv2(pi1[:, 2 * H:3 * H], pu1[:, 3 * H:4 * H],
                   att_row[:, H:2 * H], ob_row[:, H:2 * H], adj_user, True)  # (Nu, H)

    # encoder layer 2
    pu2 = jnp.dot(h_user, w2, preferred_element_type=f32) + pb2
    pi2 = jnp.dot(h_item, w2, preferred_element_type=f32) + pb2
    z_item = gatv2(pu2[:, 0:H], pi2[:, H:2 * H],
                   att_row[:, 2 * H:3 * H], ob_row[:, 2 * H:3 * H], adj_item, False)
    z_user = gatv2(pi2[:, 2 * H:3 * H], pu2[:, 3 * H:4 * H],
                   att_row[:, 3 * H:4 * H], ob_row[:, 3 * H:4 * H], adj_user, False)

    # ---------------- EdgeDecoder: in-kernel one-hot gather + MLP ------------
    row = idx[4:5, :]                                          # (1, width) user ids
    col = idx[5:6, :]                                          # (1, width) item ids
    iota_u = jax.lax.broadcasted_iota(jnp.int32, (nu, width), 0)
    iota_i = jax.lax.broadcasted_iota(jnp.int32, (ni, width), 0)
    g_u = (row == iota_u).astype(f32)                          # (Nu, width)
    g_i = (col == iota_i).astype(f32)                          # (Ni, width)
    zu_g = jax.lax.dot_general(g_u, z_user, (((0,), (0,)), ((), ())),
                               preferred_element_type=f32)     # (width, H) = z_user[row]
    zi_g = jax.lax.dot_general(g_i, z_item, (((0,), (0,)), ((), ())),
                               preferred_element_type=f32)     # (width, H) = z_item[col]

    # lin1 on the virtual concat [zu_g | zi_g] via the split decoder W1
    h = (jnp.dot(zu_g, dw1u, preferred_element_type=f32)
         + jnp.dot(zi_g, dw1i, preferred_element_type=f32) + db1)
    h = jnp.maximum(h, 0.0)

    # lin2, written lane-dense as (1, width)
    pred = jax.lax.dot_general(w2t, h, (((1,), (1,)), ((), ())),
                               preferred_element_type=f32) + db2
    out_ref[...] = pred


# ----------------------------------------------------------------------------
# Parameter init (deterministic, synthetic) + one-time slab packing
# ----------------------------------------------------------------------------
def _glorot(key, shape):
    lim = (6.0 / (shape[0] + shape[1])) ** 0.5
    return jax.random.uniform(key, shape, jnp.float32, -lim, lim)


def init_gatv2_params(key, in_src, in_dst, hidden):
    k0, k1, k2 = jax.random.split(key, 3)
    z = jnp.zeros((1, hidden), jnp.float32)
    return dict(W_l=_glorot(k0, (in_src, hidden)), W_r=_glorot(k1, (in_dst, hidden)),
                b_l=z, b_r=z, att=_glorot(k2, (1, hidden)), bias=z)


def init_model_params(key, user_feat, item_feat, hidden):
    ks = jax.random.split(key, 6)
    return dict(
        conv1_u2i=init_gatv2_params(ks[0], user_feat, item_feat, hidden),
        conv1_i2u=init_gatv2_params(ks[1], item_feat, user_feat, hidden),
        conv2_u2i=init_gatv2_params(ks[2], hidden, hidden, hidden),
        conv2_i2u=init_gatv2_params(ks[3], hidden, hidden, hidden),
        dec=dict(W1=_glorot(ks[4], (2 * hidden, hidden)),
                 b1=jnp.zeros((1, hidden), jnp.float32),
                 W2=_glorot(ks[5], (hidden, 1)),
                 b2=jnp.zeros((1, 1), jnp.float32)),
    )


def pack_params(params, hidden):
    """One-time packing of all model parameters into 2 lane-dense VMEM slabs."""
    H = hidden
    p1a, p1b = params["conv1_u2i"], params["conv1_i2u"]
    p2a, p2b = params["conv2_u2i"], params["conv2_i2u"]
    dec = params["dec"]

    r_in = _round_up(max(p1a["W_l"].shape[0], p1a["W_r"].shape[0],
                         p1b["W_l"].shape[0], p1b["W_r"].shape[0], H), 8)

    def padw(w):  # zero-pad rows (exact: padded feature columns are also zero)
        return jnp.pad(w, ((0, r_in - w.shape[0]), (0, 0)))

    w_slab = jnp.concatenate(
        [padw(p1a["W_l"]), padw(p1a["W_r"]), padw(p1b["W_l"]), padw(p1b["W_r"]),
         padw(p2a["W_l"]), padw(p2a["W_r"]), padw(p2b["W_l"]), padw(p2b["W_r"]),
         padw(dec["W1"][0:H, :]), padw(dec["W1"][H:2 * H, :])], axis=1)   # (r_in, 10H)
    w_slab = jnp.pad(w_slab, ((0, 0),
                              (0, _round_up(w_slab.shape[1], 128) - w_slab.shape[1])))

    vw = max(128, 4 * H)

    def vrow(parts):
        r = jnp.concatenate(parts, axis=1)
        return jnp.pad(r, ((0, 0), (0, vw - r.shape[1])))

    vec_slab = jnp.concatenate(
        [vrow([p1a["b_l"], p1a["b_r"], p1b["b_l"], p1b["b_r"]]),
         vrow([p2a["b_l"], p2a["b_r"], p2b["b_l"], p2b["b_r"]]),
         vrow([p1a["att"], p1b["att"], p2a["att"], p2b["att"]]),
         vrow([p1a["bias"], p1b["bias"], p2a["bias"], p2b["bias"]]),
         vrow([dec["b1"], dec["W2"].T, dec["b2"]]),
         jnp.zeros((3, vw), jnp.float32)], axis=0)                        # (8, vw)

    return dict(w_slab=w_slab, vec_slab=vec_slab)


# ----------------------------------------------------------------------------
# Model forward (eval mode) — one jit, one fused pallas_call, 5 input DMAs
# ----------------------------------------------------------------------------
@functools.partial(jax.jit, static_argnames=("hidden",))
def model_forward(packed, x_dict, edge_index_dict, edge_label_index, *, hidden):
    ei_ui = edge_index_dict[("user", "rates", "item")].astype(jnp.int32)
    ei_iu = edge_index_dict[("item", "rev_rates", "user")].astype(jnp.int32)
    lbl = edge_label_index.astype(jnp.int32)

    num_lbl = lbl.shape[1]
    width = _round_up(max(ei_ui.shape[1], ei_iu.shape[1], num_lbl), 128)

    def pad_idx(r):  # pad with -1 (never matches a node id -> no spurious edges/labels)
        return jnp.pad(r, (0, width - r.shape[0]), constant_values=-1)

    neg = jnp.full((width,), -1, jnp.int32)
    idx_slab = jnp.stack(
        [pad_idx(ei_ui[0]), pad_idx(ei_ui[1]),
         pad_idx(ei_iu[0]), pad_idx(ei_iu[1]),
         pad_idx(lbl[0]), pad_idx(lbl[1]), neg, neg], axis=0)             # (8, width)

    r_in = packed["w_slab"].shape[0]
    xu = x_dict["user"].astype(jnp.float32)
    xi = x_dict["item"].astype(jnp.float32)
    xu = jnp.pad(xu, ((0, 0), (0, r_in - xu.shape[1])))
    xi = jnp.pad(xi, ((0, 0), (0, r_in - xi.shape[1])))

    pred_row = pl.pallas_call(
        functools.partial(_fused_model_kernel, hidden=hidden),
        out_shape=jax.ShapeDtypeStruct((1, width), jnp.float32),
        in_specs=[_VMEM] * 5,
        out_specs=_VMEM,
    )(idx_slab, xu, xi, packed["w_slab"], packed["vec_slab"])

    # dropout_edge(p=0.25, training=False) -> identity edges + all-True mask
    mask = jnp.ones((num_lbl,), dtype=jnp.bool_)
    return pred_row[0, :num_lbl], mask


# ----------------------------------------------------------------------------
# Main
# ----------------------------------------------------------------------------
if __name__ == "__main__":
    hidden = 32
    num_users, num_items = 8, 12
    user_feat = 24      # age(1) + sex(2) + occupation(21)
    item_feat = 32      # synthetic (title-embedding + genres), lazy (-1,-1) in the module
    num_edges = 20
    num_label_edges = 16

    key = jax.random.PRNGKey(0)
    k_par, k_u, k_i, k_es, k_ed, k_lr, k_lc = jax.random.split(key, 7)

    params = init_model_params(k_par, user_feat, item_feat, hidden)
    packed = pack_params(params, hidden)   # packed once, outside jit

    x_dict = {
        "user": jax.random.normal(k_u, (num_users, user_feat), jnp.float32),
        "item": jax.random.normal(k_i, (num_items, item_feat), jnp.float32),
    }

    src_u = jax.random.randint(k_es, (num_edges,), 0, num_users, jnp.int32)
    dst_i = jax.random.randint(k_ed, (num_edges,), 0, num_items, jnp.int32)
    edge_index_dict = {
        ("user", "rates", "item"): jnp.stack([src_u, dst_i], axis=0),
        ("item", "rev_rates", "user"): jnp.stack([dst_i, src_u], axis=0),  # ToUndirected reverse
    }

    lbl_u = jax.random.randint(k_lr, (num_label_edges,), 0, num_users, jnp.int32)
    lbl_i = jax.random.randint(k_lc, (num_label_edges,), 0, num_items, jnp.int32)
    edge_label_index = jnp.stack([lbl_u, lbl_i], axis=0)

    pred, mask = model_forward(packed, x_dict, edge_index_dict, edge_label_index,
                               hidden=hidden)
    pred = jax.block_until_ready(pred)
    mask = jax.block_until_ready(mask)

    assert pred.shape == (num_label_edges,) and pred.dtype == jnp.float32
    assert mask.shape == (num_label_edges,) and mask.dtype == jnp.bool_
    print("KERNEL_OK")
</pallas_src>

<mosaic_0001>
module attributes {stable_mosaic.version = 11 : i64} {
  func.func @_fused_model_kernel(%arg0: memref<8x128xi32, #tpu.memory_space<vmem>>, %arg1: memref<8x32xf32, #tpu.memory_space<vmem>>, %arg2: memref<12x32xf32, #tpu.memory_space<vmem>>, %arg3: memref<32x384xf32, #tpu.memory_space<vmem>>, %arg4: memref<8x128xf32, #tpu.memory_space<vmem>>, %arg5: memref<1x128xf32, #tpu.memory_space<vmem>>) attributes {dimension_semantics = [], scalar_prefetch = 0 : i64, scratch_operands = 0 : i64, tpu.core_type = #tpu.core_type<tc>} {
    %c0 = arith.constant 0 : index
    %c0_0 = arith.constant 0 : index
    %0 = vector.load %arg0[%c0, %c0_0] : memref<8x128xi32, #tpu.memory_space<vmem>>, vector<8x128xi32>
    %1 = vector.extract_strided_slice %0 {offsets = [0, 0], sizes = [1, 128], strides = [1, 1]} : vector<8x128xi32> to vector<1x128xi32>
    %2 = vector.extract_strided_slice %0 {offsets = [1, 0], sizes = [1, 128], strides = [1, 1]} : vector<8x128xi32> to vector<1x128xi32>
    %3 = tpu.iota {dimensions = array<i32: 0>} : vector<8x128xi32>
    %4 = tpu.iota {dimensions = array<i32: 0>} : vector<12x128xi32>
    %5 = vector.broadcast %1 : vector<1x128xi32> to vector<8x128xi32>
    %6 = arith.cmpi eq, %5, %3 : vector<8x128xi32>
    %7 = arith.extui %6 : vector<8x128xi1> to vector<8x128xi32>
    %8 = arith.sitofp %7 : vector<8x128xi32> to vector<8x128xf32>
    %9 = arith.truncf %8 : vector<8x128xf32> to vector<8x128xbf16>
    %10 = vector.broadcast %2 : vector<1x128xi32> to vector<12x128xi32>
    %11 = arith.cmpi eq, %10, %4 : vector<12x128xi32>
    %12 = arith.extui %11 : vector<12x128xi1> to vector<12x128xi32>
    %13 = arith.sitofp %12 : vector<12x128xi32> to vector<12x128xf32>
    %14 = arith.truncf %13 : vector<12x128xf32> to vector<12x128xbf16>
    %cst = arith.constant dense<0.000000e+00> : vector<12x8xf32>
    %15 = tpu.matmul %14, %9, %cst {dimension_numbers = #tpu.dot_dimension_numbers<[1], [1], [0], [0], [0, 0, 1, 0], [], []>} : vector<12x128xbf16>, vector<8x128xbf16>, vector<12x8xf32> -> vector<12x8xf32>
    %16 = vector.extract_strided_slice %0 {offsets = [2, 0], sizes = [1, 128], strides = [1, 1]} : vector<8x128xi32> to vector<1x128xi32>
    %17 = vector.extract_strided_slice %0 {offsets = [3, 0], sizes = [1, 128], strides = [1, 1]} : vector<8x128xi32> to vector<1x128xi32>
    %18 = tpu.iota {dimensions = array<i32: 0>} : vector<12x128xi32>
    %19 = tpu.iota {dimensions = array<i32: 0>} : vector<8x128xi32>
    %20 = vector.broadcast %16 : vector<1x128xi32> to vector<12x128xi32>
    %21 = arith.cmpi eq, %20, %18 : vector<12x128xi32>
    %22 = arith.extui %21 : vector<12x128xi1> to vector<12x128xi32>
    %23 = arith.sitofp %22 : vector<12x128xi32> to vector<12x128xf32>
    %24 = arith.truncf %23 : vector<12x128xf32> to vector<12x128xbf16>
    %25 = vector.broadcast %17 : vector<1x128xi32> to vector<8x128xi32>
    %26 = arith.cmpi eq, %25, %19 : vector<8x128xi32>
    %27 = arith.extui %26 : vector<8x128xi1> to vector<8x128xi32>
    %28 = arith.sitofp %27 : vector<8x128xi32> to vector<8x128xf32>
    %29 = arith.truncf %28 : vector<8x128xf32> to vector<8x128xbf16>
    %cst_1 = arith.constant dense<0.000000e+00> : vector<8x12xf32>
    %30 = tpu.matmul %29, %24, %cst_1 {dimension_numbers = #tpu.dot_dimension_numbers<[1], [1], [0], [0], [0, 0, 1, 0], [], []>} : vector<8x128xbf16>, vector<12x128xbf16>, vector<8x12xf32> -> vector<8x12xf32>
    %c0_2 = arith.constant 0 : index
    %c0_3 = arith.constant 0 : index
    %31 = vector.load %arg3[%c0_2, %c0_3] : memref<32x384xf32, #tpu.memory_space<vmem>>, vector<32x128xf32>
    %c0_4 = arith.constant 0 : index
    %c128 = arith.constant 128 : index
    %32 = vector.load %arg3[%c0_4, %c128] : memref<32x384xf32, #tpu.memory_space<vmem>>, vector<32x128xf32>
    %c0_5 = arith.constant 0 : index
    %c256 = arith.constant 256 : index
    %33 = vector.load %arg3[%c0_5, %c256] : memref<32x384xf32, #tpu.memory_space<vmem>>, vector<32x32xf32>
    %c0_6 = arith.constant 0 : index
    %c288 = arith.constant 288 : index
    %34 = vector.load %arg3[%c0_6, %c288] : memref<32x384xf32, #tpu.memory_space<vmem>>, vector<32x32xf32>
    %c0_7 = arith.constant 0 : index
    %c0_8 = arith.constant 0 : index
    %35 = vector.load %arg4[%c0_7, %c0_8] : memref<8x128xf32, #tpu.memory_space<vmem>>, vector<8x128xf32>
    %36 = vector.extract_strided_slice %35 {offsets = [0, 0], sizes = [1, 128], strides = [1, 1]} : vector<8x128xf32> to vector<1x128xf32>
    %37 = vector.extract_strided_slice %35 {offsets = [1, 0], sizes = [1, 128], strides = [1, 1]} : vector<8x128xf32> to vector<1x128xf32>
    %38 = vector.extract_strided_slice %35 {offsets = [2, 0], sizes = [1, 128], strides = [1, 1]} : vector<8x128xf32> to vector<1x128xf32>
    %39 = vector.extract_strided_slice %35 {offsets = [3, 0], sizes = [1, 128], strides = [1, 1]} : vector<8x128xf32> to vector<1x128xf32>
    %40 = vector.extract_strided_slice %35 {offsets = [4, 0], sizes = [1, 32], strides = [1, 1]} : vector<8x128xf32> to vector<1x32xf32>
    %41 = vector.extract_strided_slice %35 {offsets = [4, 32], sizes = [1, 32], strides = [1, 1]} : vector<8x128xf32> to vector<1x32xf32>
    %42 = vector.extract_strided_slice %35 {offsets = [4, 64], sizes = [1, 1], strides = [1, 1]} : vector<8x128xf32> to vector<1x1xf32>
    %c0_9 = arith.constant 0 : index
    %c0_10 = arith.constant 0 : index
    %43 = vector.load %arg1[%c0_9, %c0_10] : memref<8x32xf32, #tpu.memory_space<vmem>>, vector<8x32xf32>
    %c0_11 = arith.constant 0 : index
    %c0_12 = arith.constant 0 : index
    %44 = vector.load %arg2[%c0_11, %c0_12] : memref<12x32xf32, #tpu.memory_space<vmem>>, vector<12x32xf32>
    %cst_13 = arith.constant dense<0.000000e+00> : vector<8x128xf32>
    %45 = tpu.matmul %43, %31, %cst_13 {dimension_numbers = #tpu.dot_dimension_numbers<[1], [0], [0], [1], [0, 0, 1, 1], [], []>} : vector<8x32xf32>, vector<32x128xf32>, vector<8x128xf32> -> vector<8x128xf32>
    %46 = vector.broadcast %36 : vector<1x128xf32> to vector<8x128xf32>
    %47 = arith.addf %45, %46 : vector<8x128xf32>
    %cst_14 = arith.constant dense<0.000000e+00> : vector<12x128xf32>
    %48 = tpu.matmul %44, %31, %cst_14 {dimension_numbers = #tpu.dot_dimension_numbers<[1], [0], [0], [1], [0, 0, 1, 1], [], []>} : vector<12x32xf32>, vector<32x128xf32>, vector<12x128xf32> -> vector<12x128xf32>
    %49 = vector.broadcast %36 : vector<1x128xf32> to vector<12x128xf32>
    %50 = arith.addf %48, %49 : vector<12x128xf32>
    %51 = vector.extract_strided_slice %47 {offsets = [0, 0], sizes = [8, 32], strides = [1, 1]} : vector<8x128xf32> to vector<8x32xf32>
    %52 = vector.extract_strided_slice %50 {offsets = [0, 32], sizes = [12, 32], strides = [1, 1]} : vector<12x128xf32> to vector<12x32xf32>
    %53 = vector.extract_strided_slice %38 {offsets = [0, 0], sizes = [1, 32], strides = [1, 1]} : vector<1x128xf32> to vector<1x32xf32>
    %54 = vector.extract_strided_slice %39 {offsets = [0, 0], sizes = [1, 32], strides = [1, 1]} : vector<1x128xf32> to vector<1x32xf32>
    %cst_15 = arith.constant 0.000000e+00 : f32
    %55 = vector.broadcast %cst_15 : f32 to vector<1x32xf32>
    %56 = arith.cmpf oge, %53, %55 : vector<1x32xf32>
    %cst_16 = arith.constant 1.000000e+00 : f32
    %cst_17 = arith.constant -1.000000e+00 : f32
    %57 = vector.broadcast %cst_16 : f32 to vector<1x32xf32>
    %58 = vector.broadcast %cst_17 : f32 to vector<1x32xf32>
    %59 = arith.select %56, %57, %58 : vector<1x32xi1>, vector<1x32xf32>
    %60 = vector.broadcast %53 : vector<1x32xf32> to vector<8x32xf32>
    %61 = arith.mulf %51, %60 : vector<8x32xf32>
    %62 = vector.broadcast %53 : vector<1x32xf32> to vector<12x32xf32>
    %63 = arith.mulf %52, %62 : vector<12x32xf32>
    %cst_18 = arith.constant dense<0.000000e+00> : vector<12xf32>
    %64 = vector.multi_reduction <add>, %63, %cst_18 [1] : vector<12x32xf32> to vector<12xf32>
    %65 = vector.shape_cast %64 : vector<12xf32> to vector<12x1xf32>
    %cst_19 = arith.constant dense<0.000000e+00> : vector<1x8xf32>
    %66 = tpu.matmul %53, %51, %cst_19 {dimension_numbers = #tpu.dot_dimension_numbers<[1], [1], [0], [0], [0, 0, 1, 0], [], []>} : vector<1x32xf32>, vector<8x32xf32>, vector<1x8xf32> -> vector<1x8xf32>
    %67 = vector.shape_cast %63 : vector<12x32xf32> to vector<12x1x32xf32>
    %68 = vector.shape_cast %61 : vector<8x32xf32> to vector<1x8x32xf32>
    %69 = vector.broadcast %67 : vector<12x1x32xf32> to vector<12x8x32xf32>
    %70 = vector.broadcast %68 : vector<1x8x32xf32> to vector<12x8x32xf32>
    %71 = arith.addf %69, %70 : vector<12x8x32xf32>
    %72 = math.absf %71 : vector<12x8x32xf32>
    %73 = vector.shape_cast %59 : vector<1x32xf32> to vector<1x1x32xf32>
    %74 = vector.broadcast %73 : vector<1x1x32xf32> to vector<12x8x32xf32>
    %75 = arith.mulf %72, %74 : vector<12x8x32xf32>
    %cst_20 = arith.constant dense<0.000000e+00> : vector<12x8xf32>
    %76 = vector.multi_reduction <add>, %75, %cst_20 [2] : vector<12x8x32xf32> to vector<12x8xf32>
    %77 = vector.broadcast %65 : vector<12x1xf32> to vector<12x8xf32>
    %78 = vector.broadcast %66 : vector<1x8xf32> to vector<12x8xf32>
    %79 = arith.addf %77, %78 : vector<12x8xf32>
    %cst_21 = arith.constant 6.000000e-01 : f32
    %80 = vector.broadcast %cst_21 : f32 to vector<12x8xf32>
    %81 = arith.mulf %80, %79 : vector<12x8xf32>
    %cst_22 = arith.constant 4.000000e-01 : f32
    %82 = vector.broadcast %cst_22 : f32 to vector<12x8xf32>
    %83 = arith.mulf %82, %76 : vector<12x8xf32>
    %84 = arith.addf %81, %83 : vector<12x8xf32>
    %cst_23 = arith.constant 0.000000e+00 : f32
    %85 = vector.broadcast %cst_23 : f32 to vector<12x8xf32>
    %86 = arith.cmpf ogt, %15, %85 : vector<12x8xf32>
    %cst_24 = arith.constant -1.000000e+30 : f32
    %87 = vector.broadcast %cst_24 : f32 to vector<12x8xf32>
    %88 = arith.select %86, %84, %87 : vector<12x8xi1>, vector<12x8xf32>
    %cst_25 = arith.constant dense<0xFF800000> : vector<12xf32>
    %89 = vector.multi_reduction <maximumf>, %88, %cst_25 [1] : vector<12x8xf32> to vector<12xf32>
    %90 = vector.shape_cast %89 : vector<12xf32> to vector<12x1xf32>
    %91 = vector.broadcast %90 : vector<12x1xf32> to vector<12x8xf32>
    %92 = arith.subf %88, %91 : vector<12x8xf32>
    %93 = math.exp %92 : vector<12x8xf32>
    %94 = arith.mulf %93, %15 : vector<12x8xf32>
    %cst_26 = arith.constant dense<0.000000e+00> : vector<12xf32>
    %95 = vector.multi_reduction <add>, %94, %cst_26 [1] : vector<12x8xf32> to vector<12xf32>
    %96 = vector.shape_cast %95 : vector<12xf32> to vector<12x1xf32>
    %cst_27 = arith.constant 0.000000e+00 : f32
    %97 = vector.broadcast %cst_27 : f32 to vector<12x1xf32>
    %98 = arith.cmpf ogt, %96, %97 : vector<12x1xf32>
    %cst_28 = arith.constant 1.000000e+00 : f32
    %99 = vector.broadcast %cst_28 : f32 to vector<12x1xf32>
    %100 = arith.select %98, %96, %99 : vector<12x1xi1>, vector<12x1xf32>
    %101 = vector.broadcast %100 : vector<12x1xf32> to vector<12x8xf32>
    %102 = arith.divf %94, %101 : vector<12x8xf32>
    %cst_29 = arith.constant dense<0.000000e+00> : vector<12x32xf32>
    %103 = tpu.matmul %102, %51, %cst_29 {dimension_numbers = #tpu.dot_dimension_numbers<[1], [0], [0], [1], [0, 0, 1, 1], [], []>} : vector<12x8xf32>, vector<8x32xf32>, vector<12x32xf32> -> vector<12x32xf32>
    %104 = vector.broadcast %54 : vector<1x32xf32> to vector<12x32xf32>
    %105 = arith.addf %103, %104 : vector<12x32xf32>
    %cst_30 = arith.constant 0.000000e+00 : f32
    %106 = vector.broadcast %cst_30 : f32 to vector<12x32xf32>
    %107 = arith.maximumf %105, %106 : vector<12x32xf32>
    %108 = vector.extract_strided_slice %50 {offsets = [0, 64], sizes = [12, 32], strides = [1, 1]} : vector<12x128xf32> to vector<12x32xf32>
    %109 = vector.extract_strided_slice %47 {offsets = [0, 96], sizes = [8, 32], strides = [1, 1]} : vector<8x128xf32> to vector<8x32xf32>
    %110 = vector.extract_strided_slice %38 {offsets = [0, 32], sizes = [1, 32], strides = [1, 1]} : vector<1x128xf32> to vector<1x32xf32>
    %111 = vector.extract_strided_slice %39 {offsets = [0, 32], sizes = [1, 32], strides = [1, 1]} : vector<1x128xf32> to vector<1x32xf32>
    %cst_31 = arith.constant 0.000000e+00 : f32
    %112 = vector.broadcast %cst_31 : f32 to vector<1x32xf32>
    %113 = arith.cmpf oge, %110, %112 : vector<1x32xf32>
    %cst_32 = arith.constant 1.000000e+00 : f32
    %cst_33 = arith.constant -1.000000e+00 : f32
    %114 = vector.broadcast %cst_32 : f32 to vector<1x32xf32>
    %115 = vector.broadcast %cst_33 : f32 to vector<1x32xf32>
    %116 = arith.select %113, %114, %115 : vector<1x32xi1>, vector<1x32xf32>
    %117 = vector.broadcast %110 : vector<1x32xf32> to vector<12x32xf32>
    %118 = arith.mulf %108, %117 : vector<12x32xf32>
    %119 = vector.broadcast %110 : vector<1x32xf32> to vector<8x32xf32>
    %120 = arith.mulf %109, %119 : vector<8x32xf32>
    %cst_34 = arith.constant dense<0.000000e+00> : vector<8xf32>
    %121 = vector.multi_reduction <add>, %120, %cst_34 [1] : vector<8x32xf32> to vector<8xf32>
    %122 = vector.shape_cast %121 : vector<8xf32> to vector<8x1xf32>
    %cst_35 = arith.constant dense<0.000000e+00> : vector<1x12xf32>
    %123 = tpu.matmul %110, %108, %cst_35 {dimension_numbers = #tpu.dot_dimension_numbers<[1], [1], [0], [0], [0, 0, 1, 0], [], []>} : vector<1x32xf32>, vector<12x32xf32>, vector<1x12xf32> -> vector<1x12xf32>
    %124 = vector.shape_cast %120 : vector<8x32xf32> to vector<8x1x32xf32>
    %125 = vector.shape_cast %118 : vector<12x32xf32> to vector<1x12x32xf32>
    %126 = vector.broadcast %124 : vector<8x1x32xf32> to vector<8x12x32xf32>
    %127 = vector.broadcast %125 : vector<1x12x32xf32> to vector<8x12x32xf32>
    %128 = arith.addf %126, %127 : vector<8x12x32xf32>
    %129 = math.absf %128 : vector<8x12x32xf32>
    %130 = vector.shape_cast %116 : vector<1x32xf32> to vector<1x1x32xf32>
    %131 = vector.broadcast %130 : vector<1x1x32xf32> to vector<8x12x32xf32>
    %132 = arith.mulf %129, %131 : vector<8x12x32xf32>
    %cst_36 = arith.constant dense<0.000000e+00> : vector<8x12xf32>
    %133 = vector.multi_reduction <add>, %132, %cst_36 [2] : vector<8x12x32xf32> to vector<8x12xf32>
    %134 = vector.broadcast %122 : vector<8x1xf32> to vector<8x12xf32>
    %135 = vector.broadcast %123 : vector<1x12xf32> to vector<8x12xf32>
    %136 = arith.addf %134, %135 : vector<8x12xf32>
    %cst_37 = arith.constant 6.000000e-01 : f32
    %137 = vector.broadcast %cst_37 : f32 to vector<8x12xf32>
    %138 = arith.mulf %137, %136 : vector<8x12xf32>
    %cst_38 = arith.constant 4.000000e-01 : f32
    %139 = vector.broadcast %cst_38 : f32 to vector<8x12xf32>
    %140 = arith.mulf %139, %133 : vector<8x12xf32>
    %141 = arith.addf %138, %140 : vector<8x12xf32>
    %cst_39 = arith.constant 0.000000e+00 : f32
    %142 = vector.broadcast %cst_39 : f32 to vector<8x12xf32>
    %143 = arith.cmpf ogt, %30, %142 : vector<8x12xf32>
    %cst_40 = arith.constant -1.000000e+30 : f32
    %144 = vector.broadcast %cst_40 : f32 to vector<8x12xf32>
    %145 = arith.select %143, %141, %144 : vector<8x12xi1>, vector<8x12xf32>
    %cst_41 = arith.constant dense<0xFF800000> : vector<8xf32>
    %146 = vector.multi_reduction <maximumf>, %145, %cst_41 [1] : vector<8x12xf32> to vector<8xf32>
    %147 = vector.shape_cast %146 : vector<8xf32> to vector<8x1xf32>
    %148 = vector.broadcast %147 : vector<8x1xf32> to vector<8x12xf32>
    %149 = arith.subf %145, %148 : vector<8x12xf32>
    %150 = math.exp %149 : vector<8x12xf32>
    %151 = arith.mulf %150, %30 : vector<8x12xf32>
    %cst_42 = arith.constant dense<0.000000e+00> : vector<8xf32>
    %152 = vector.multi_reduction <add>, %151, %cst_42 [1] : vector<8x12xf32> to vector<8xf32>
    %153 = vector.shape_cast %152 : vector<8xf32> to vector<8x1xf32>
    %cst_43 = arith.constant 0.000000e+00 : f32
    %154 = vector.broadcast %cst_43 : f32 to vector<8x1xf32>
    %155 = arith.cmpf ogt, %153, %154 : vector<8x1xf32>
    %cst_44 = arith.constant 1.000000e+00 : f32
    %156 = vector.broadcast %cst_44 : f32 to vector<8x1xf32>
    %157 = arith.select %155, %153, %156 : vector<8x1xi1>, vector<8x1xf32>
    %158 = vector.broadcast %157 : vector<8x1xf32> to vector<8x12xf32>
    %159 = arith.divf %151, %158 : vector<8x12xf32>
    %cst_45 = arith.constant dense<0.000000e+00> : vector<8x32xf32>
    %160 = tpu.matmul %159, %108, %cst_45 {dimension_numbers = #tpu.dot_dimension_numbers<[1], [0], [0], [1], [0, 0, 1, 1], [], []>} : vector<8x12xf32>, vector<12x32xf32>, vector<8x32xf32> -> vector<8x32xf32>
    %161 = vector.broadcast %111 : vector<1x32xf32> to vector<8x32xf32>
    %162 = arith.addf %160, %161 : vector<8x32xf32>
    %cst_46 = arith.constant 0.000000e+00 : f32
    %163 = vector.broadcast %cst_46 : f32 to vector<8x32xf32>
    %164 = arith.maximumf %162, %163 : vector<8x32xf32>
    %cst_47 = arith.constant dense<0.000000e+00> : vector<8x128xf32>
    %165 = tpu.matmul %164, %32, %cst_47 {dimension_numbers = #tpu.dot_dimension_numbers<[1], [0], [0], [1], [0, 0, 1, 1], [], []>} : vector<8x32xf32>, vector<32x128xf32>, vector<8x128xf32> -> vector<8x128xf32>
    %166 = vector.broadcast %37 : vector<1x128xf32> to vector<8x128xf32>
    %167 = arith.addf %165, %166 : vector<8x128xf32>
    %cst_48 = arith.constant dense<0.000000e+00> : vector<12x128xf32>
    %168 = tpu.matmul %107, %32, %cst_48 {dimension_numbers = #tpu.dot_dimension_numbers<[1], [0], [0], [1], [0, 0, 1, 1], [], []>} : vector<12x32xf32>, vector<32x128xf32>, vector<12x128xf32> -> vector<12x128xf32>
    %169 = vector.broadcast %37 : vector<1x128xf32> to vector<12x128xf32>
    %170 = arith.addf %168, %169 : vector<12x128xf32>
    %171 = vector.extract_strided_slice %167 {offsets = [0, 0], sizes = [8, 32], strides = [1, 1]} : vector<8x128xf32> to vector<8x32xf32>
    %172 = vector.extract_strided_slice %170 {offsets = [0, 32], sizes = [12, 32], strides = [1, 1]} : vector<12x128xf32> to vector<12x32xf32>
    %173 = vector.extract_strided_slice %38 {offsets = [0, 64], sizes = [1, 32], strides = [1, 1]} : vector<1x128xf32> to vector<1x32xf32>
    %174 = vector.extract_strided_slice %39 {offsets = [0, 64], sizes = [1, 32], strides = [1, 1]} : vector<1x128xf32> to vector<1x32xf32>
    %cst_49 = arith.constant 0.000000e+00 : f32
    %175 = vector.broadcast %cst_49 : f32 to vector<1x32xf32>
    %176 = arith.cmpf oge, %173, %175 : vector<1x32xf32>
    %cst_50 = arith.constant 1.000000e+00 : f32
    %cst_51 = arith.constant -1.000000e+00 : f32
    %177 = vector.broadcast %cst_50 : f32 to vector<1x32xf32>
    %178 = vector.broadcast %cst_51 : f32 to vector<1x32xf32>
    %179 = arith.select %176, %177, %178 : vector<1x32xi1>, vector<1x32xf32>
    %180 = vector.broadcast %173 : vector<1x32xf32> to vector<8x32xf32>
    %181 = arith.mulf %171, %180 : vector<8x32xf32>
    %182 = vector.broadcast %173 : vector<1x32xf32> to vector<12x32xf32>
    %183 = arith.mulf %172, %182 : vector<12x32xf32>
    %cst_52 = arith.constant dense<0.000000e+00> : vector<12xf32>
    %184 = vector.multi_reduction <add>, %183, %cst_52 [1] : vector<12x32xf32> to vector<12xf32>
    %185 = vector.shape_cast %184 : vector<12xf32> to vector<12x1xf32>
    %cst_53 = arith.constant dense<0.000000e+00> : vector<1x8xf32>
    %186 = tpu.matmul %173, %171, %cst_53 {dimension_numbers = #tpu.dot_dimension_numbers<[1], [1], [0], [0], [0, 0, 1, 0], [], []>} : vector<1x32xf32>, vector<8x32xf32>, vector<1x8xf32> -> vector<1x8xf32>
    %187 = vector.shape_cast %183 : vector<12x32xf32> to vector<12x1x32xf32>
    %188 = vector.shape_cast %181 : vector<8x32xf32> to vector<1x8x32xf32>
    %189 = vector.broadcast %187 : vector<12x1x32xf32> to vector<12x8x32xf32>
    %190 = vector.broadcast %188 : vector<1x8x32xf32> to vector<12x8x32xf32>
    %191 = arith.addf %189, %190 : vector<12x8x32xf32>
    %192 = math.absf %191 : vector<12x8x32xf32>
    %193 = vector.shape_cast %179 : vector<1x32xf32> to vector<1x1x32xf32>
    %194 = vector.broadcast %193 : vector<1x1x32xf32> to vector<12x8x32xf32>
    %195 = arith.mulf %192, %194 : vector<12x8x32xf32>
    %cst_54 = arith.constant dense<0.000000e+00> : vector<12x8xf32>
    %196 = vector.multi_reduction <add>, %195, %cst_54 [2] : vector<12x8x32xf32> to vector<12x8xf32>
    %197 = vector.broadcast %185 : vector<12x1xf32> to vector<12x8xf32>
    %198 = vector.broadcast %186 : vector<1x8xf32> to vector<12x8xf32>
    %199 = arith.addf %197, %198 : vector<12x8xf32>
    %cst_55 = arith.constant 6.000000e-01 : f32
    %200 = vector.broadcast %cst_55 : f32 to vector<12x8xf32>
    %201 = arith.mulf %200, %199 : vector<12x8xf32>
    %cst_56 = arith.constant 4.000000e-01 : f32
    %202 = vector.broadcast %cst_56 : f32 to vector<12x8xf32>
    %203 = arith.mulf %202, %196 : vector<12x8xf32>
    %204 = arith.addf %201, %203 : vector<12x8xf32>
    %cst_57 = arith.constant 0.000000e+00 : f32
    %205 = vector.broadcast %cst_57 : f32 to vector<12x8xf32>
    %206 = arith.cmpf ogt, %15, %205 : vector<12x8xf32>
    %cst_58 = arith.constant -1.000000e+30 : f32
    %207 = vector.broadcast %cst_58 : f32 to vector<12x8xf32>
    %208 = arith.select %206, %204, %207 : vector<12x8xi1>, vector<12x8xf32>
    %cst_59 = arith.constant dense<0xFF800000> : vector<12xf32>
    %209 = vector.multi_reduction <maximumf>, %208, %cst_59 [1] : vector<12x8xf32> to vector<12xf32>
    %210 = vector.shape_cast %209 : vector<12xf32> to vector<12x1xf32>
    %211 = vector.broadcast %210 : vector<12x1xf32> to vector<12x8xf32>
    %212 = arith.subf %208, %211 : vector<12x8xf32>
    %213 = math.exp %212 : vector<12x8xf32>
    %214 = arith.mulf %213, %15 : vector<12x8xf32>
    %cst_60 = arith.constant dense<0.000000e+00> : vector<12xf32>
    %215 = vector.multi_reduction <add>, %214, %cst_60 [1] : vector<12x8xf32> to vector<12xf32>
    %216 = vector.shape_cast %215 : vector<12xf32> to vector<12x1xf32>
    %cst_61 = arith.constant 0.000000e+00 : f32
    %217 = vector.broadcast %cst_61 : f32 to vector<12x1xf32>
    %218 = arith.cmpf ogt, %216, %217 : vector<12x1xf32>
    %cst_62 = arith.constant 1.000000e+00 : f32
    %219 = vector.broadcast %cst_62 : f32 to vector<12x1xf32>
    %220 = arith.select %218, %216, %219 : vector<12x1xi1>, vector<12x1xf32>
    %221 = vector.broadcast %220 : vector<12x1xf32> to vector<12x8xf32>
    %222 = arith.divf %214, %221 : vector<12x8xf32>
    %cst_63 = arith.constant dense<0.000000e+00> : vector<12x32xf32>
    %223 = tpu.matmul %222, %171, %cst_63 {dimension_numbers = #tpu.dot_dimension_numbers<[1], [0], [0], [1], [0, 0, 1, 1], [], []>} : vector<12x8xf32>, vector<8x32xf32>, vector<12x32xf32> -> vector<12x32xf32>
    %224 = vector.broadcast %174 : vector<1x32xf32> to vector<12x32xf32>
    %225 = arith.addf %223, %224 : vector<12x32xf32>
    %226 = vector.extract_strided_slice %170 {offsets = [0, 64], sizes = [12, 32], strides = [1, 1]} : vector<12x128xf32> to vector<12x32xf32>
    %227 = vector.extract_strided_slice %167 {offsets = [0, 96], sizes = [8, 32], strides = [1, 1]} : vector<8x128xf32> to vector<8x32xf32>
    %228 = vector.extract_strided_slice %38 {offsets = [0, 96], sizes = [1, 32], strides = [1, 1]} : vector<1x128xf32> to vector<1x32xf32>
    %229 = vector.extract_strided_slice %39 {offsets = [0, 96], sizes = [1, 32], strides = [1, 1]} : vector<1x128xf32> to vector<1x32xf32>
    %cst_64 = arith.constant 0.000000e+00 : f32
    %230 = vector.broadcast %cst_64 : f32 to vector<1x32xf32>
    %231 = arith.cmpf oge, %228, %230 : vector<1x32xf32>
    %cst_65 = arith.constant 1.000000e+00 : f32
    %cst_66 = arith.constant -1.000000e+00 : f32
    %232 = vector.broadcast %cst_65 : f32 to vector<1x32xf32>
    %233 = vector.broadcast %cst_66 : f32 to vector<1x32xf32>
    %234 = arith.select %231, %232, %233 : vector<1x32xi1>, vector<1x32xf32>
    %235 = vector.broadcast %228 : vector<1x32xf32> to vector<12x32xf32>
    %236 = arith.mulf %226, %235 : vector<12x32xf32>
    %237 = vector.broadcast %228 : vector<1x32xf32> to vector<8x32xf32>
    %238 = arith.mulf %227, %237 : vector<8x32xf32>
    %cst_67 = arith.constant dense<0.000000e+00> : vector<8xf32>
    %239 = vector.multi_reduction <add>, %238, %cst_67 [1] : vector<8x32xf32> to vector<8xf32>
    %240 = vector.shape_cast %239 : vector<8xf32> to vector<8x1xf32>
    %cst_68 = arith.constant dense<0.000000e+00> : vector<1x12xf32>
    %241 = tpu.matmul %228, %226, %cst_68 {dimension_numbers = #tpu.dot_dimension_numbers<[1], [1], [0], [0], [0, 0, 1, 0], [], []>} : vector<1x32xf32>, vector<12x32xf32>, vector<1x12xf32> -> vector<1x12xf32>
    %242 = vector.shape_cast %238 : vector<8x32xf32> to vector<8x1x32xf32>
    %243 = vector.shape_cast %236 : vector<12x32xf32> to vector<1x12x32xf32>
    %244 = vector.broadcast %242 : vector<8x1x32xf32> to vector<8x12x32xf32>
    %245 = vector.broadcast %243 : vector<1x12x32xf32> to vector<8x12x32xf32>
    %246 = arith.addf %244, %245 : vector<8x12x32xf32>
    %247 = math.absf %246 : vector<8x12x32xf32>
    %248 = vector.shape_cast %234 : vector<1x32xf32> to vector<1x1x32xf32>
    %249 = vector.broadcast %248 : vector<1x1x32xf32> to vector<8x12x32xf32>
    %250 = arith.mulf %247, %249 : vector<8x12x32xf32>
    %cst_69 = arith.constant dense<0.000000e+00> : vector<8x12xf32>
    %251 = vector.multi_reduction <add>, %250, %cst_69 [2] : vector<8x12x32xf32> to vector<8x12xf32>
    %252 = vector.broadcast %240 : vector<8x1xf32> to vector<8x12xf32>
    %253 = vector.broadcast %241 : vector<1x12xf32> to vector<8x12xf32>
    %254 = arith.addf %252, %253 : vector<8x12xf32>
    %cst_70 = arith.constant 6.000000e-01 : f32
    %255 = vector.broadcast %cst_70 : f32 to vector<8x12xf32>
    %256 = arith.mulf %255, %254 : vector<8x12xf32>
    %cst_71 = arith.constant 4.000000e-01 : f32
    %257 = vector.broadcast %cst_71 : f32 to vector<8x12xf32>
    %258 = arith.mulf %257, %251 : vector<8x12xf32>
    %259 = arith.addf %256, %258 : vector<8x12xf32>
    %cst_72 = arith.constant 0.000000e+00 : f32
    %260 = vector.broadcast %cst_72 : f32 to vector<8x12xf32>
    %261 = arith.cmpf ogt, %30, %260 : vector<8x12xf32>
    %cst_73 = arith.constant -1.000000e+30 : f32
    %262 = vector.broadcast %cst_73 : f32 to vector<8x12xf32>
    %263 = arith.select %261, %259, %262 : vector<8x12xi1>, vector<8x12xf32>
    %cst_74 = arith.constant dense<0xFF800000> : vector<8xf32>
    %264 = vector.multi_reduction <maximumf>, %263, %cst_74 [1] : vector<8x12xf32> to vector<8xf32>
    %265 = vector.shape_cast %264 : vector<8xf32> to vector<8x1xf32>
    %266 = vector.broadcast %265 : vector<8x1xf32> to vector<8x12xf32>
    %267 = arith.subf %263, %266 : vector<8x12xf32>
    %268 = math.exp %267 : vector<8x12xf32>
    %269 = arith.mulf %268, %30 : vector<8x12xf32>
    %cst_75 = arith.constant dense<0.000000e+00> : vector<8xf32>
    %270 = vector.multi_reduction <add>, %269, %cst_75 [1] : vector<8x12xf32> to vector<8xf32>
    %271 = vector.shape_cast %270 : vector<8xf32> to vector<8x1xf32>
    %cst_76 = arith.constant 0.000000e+00 : f32
    %272 = vector.broadcast %cst_76 : f32 to vector<8x1xf32>
    %273 = arith.cmpf ogt, %271, %272 : vector<8x1xf32>
    %cst_77 = arith.constant 1.000000e+00 : f32
    %274 = vector.broadcast %cst_77 : f32 to vector<8x1xf32>
    %275 = arith.select %273, %271, %274 : vector<8x1xi1>, vector<8x1xf32>
    %276 = vector.broadcast %275 : vector<8x1xf32> to vector<8x12xf32>
    %277 = arith.divf %269, %276 : vector<8x12xf32>
    %cst_78 = arith.constant dense<0.000000e+00> : vector<8x32xf32>
    %278 = tpu.matmul %277, %226, %cst_78 {dimension_numbers = #tpu.dot_dimension_numbers<[1], [0], [0], [1], [0, 0, 1, 1], [], []>} : vector<8x12xf32>, vector<12x32xf32>, vector<8x32xf32> -> vector<8x32xf32>
    %279 = vector.broadcast %229 : vector<1x32xf32> to vector<8x32xf32>
    %280 = arith.addf %278, %279 : vector<8x32xf32>
    %281 = vector.extract_strided_slice %0 {offsets = [4, 0], sizes = [1, 128], strides = [1, 1]} : vector<8x128xi32> to vector<1x128xi32>
    %282 = vector.extract_strided_slice %0 {offsets = [5, 0], sizes = [1, 128], strides = [1, 1]} : vector<8x128xi32> to vector<1x128xi32>
    %283 = tpu.iota {dimensions = array<i32: 0>} : vector<8x128xi32>
    %284 = tpu.iota {dimensions = array<i32: 0>} : vector<12x128xi32>
    %285 = vector.broadcast %281 : vector<1x128xi32> to vector<8x128xi32>
    %286 = arith.cmpi eq, %285, %283 : vector<8x128xi32>
    %287 = arith.extui %286 : vector<8x128xi1> to vector<8x128xi32>
    %288 = arith.sitofp %287 : vector<8x128xi32> to vector<8x128xf32>
    %289 = vector.broadcast %282 : vector<1x128xi32> to vector<12x128xi32>
    %290 = arith.cmpi eq, %289, %284 : vector<12x128xi32>
    %291 = arith.extui %290 : vector<12x128xi1> to vector<12x128xi32>
    %292 = arith.sitofp %291 : vector<12x128xi32> to vector<12x128xf32>
    %cst_79 = arith.constant dense<0.000000e+00> : vector<128x32xf32>
    %293 = tpu.matmul %288, %280, %cst_79 {dimension_numbers = #tpu.dot_dimension_numbers<[0], [0], [1], [1], [0, 1, 1, 1], [], []>} : vector<8x128xf32>, vector<8x32xf32>, vector<128x32xf32> -> vector<128x32xf32>
    %cst_80 = arith.constant dense<0.000000e+00> : vector<128x32xf32>
    %294 = tpu.matmul %292, %225, %cst_80 {dimension_numbers = #tpu.dot_dimension_numbers<[0], [0], [1], [1], [0, 1, 1, 1], [], []>} : vector<12x128xf32>, vector<12x32xf32>, vector<128x32xf32> -> vector<128x32xf32>
    %cst_81 = arith.constant dense<0.000000e+00> : vector<128x32xf32>
    %295 = tpu.matmul %293, %33, %cst_81 {dimension_numbers = #tpu.dot_dimension_numbers<[1], [0], [0], [1], [0, 0, 1, 1], [], []>} : vector<128x32xf32>, vector<32x32xf32>, vector<128x32xf32> -> vector<128x32xf32>
    %cst_82 = arith.constant dense<0.000000e+00> : vector<128x32xf32>
    %296 = tpu.matmul %294, %34, %cst_82 {dimension_numbers = #tpu.dot_dimension_numbers<[1], [0], [0], [1], [0, 0, 1, 1], [], []>} : vector<128x32xf32>, vector<32x32xf32>, vector<128x32xf32> -> vector<128x32xf32>
    %297 = arith.addf %295, %296 : vector<128x32xf32>
    %298 = vector.broadcast %40 : vector<1x32xf32> to vector<128x32xf32>
    %299 = arith.addf %297, %298 : vector<128x32xf32>
    %cst_83 = arith.constant 0.000000e+00 : f32
    %300 = vector.broadcast %cst_83 : f32 to vector<128x32xf32>
    %301 = arith.maximumf %299, %300 : vector<128x32xf32>
    %cst_84 = arith.constant dense<0.000000e+00> : vector<1x128xf32>
    %302 = tpu.matmul %41, %301, %cst_84 {dimension_numbers = #tpu.dot_dimension_numbers<[1], [1], [0], [0], [0, 0, 1, 0], [], []>} : vector<1x32xf32>, vector<128x32xf32>, vector<1x128xf32> -> vector<1x128xf32>
    %303 = vector.broadcast %42 : vector<1x1xf32> to vector<1x128xf32>
    %304 = arith.addf %302, %303 : vector<1x128xf32>
    %c0_85 = arith.constant 0 : index
    %c0_86 = arith.constant 0 : index
    %305 = vector.load %arg5[%c0_85, %c0_86] : memref<1x128xf32, #tpu.memory_space<vmem>>, vector<1x128xf32>
    tpu.vector_store %arg5[%c0_85, %c0_86], %304 {strides = array<i32>} : memref<1x128xf32, #tpu.memory_space<vmem>>, vector<1x128xf32>,
    return
  }
}

</mosaic_0001>

<bundles_post_ra>
// kernel: model_forward.1
= control target key start
LH: loop header
LB: loop body
LE: loop exit
PB: predicated region body
PF: predicated region fallthrough
CT: control target
= control target key end

     0   :  { %10 = vsyncpa [#allocation3], 0  ;;  %s2525_s21 = smov [#allocation2]   ;;  %s2526_s23 = smov 384   ;;  %s3288_s0 = inlined_call_operand.vmem [shape: s32[8,128], index: 0, kind: input, shape index: {}]   ;;  %s3289_s1 = inlined_call_operand.vmem [shape: f32[8,32], index: 1, kind: input, shape index: {}]   ;;  %s3290_s2 = inlined_call_operand.vmem [shape: f32[12,32], index: 2, kind: input, shape index: {}]   ;;  %s3291_s3 = inlined_call_operand.hbm [shape: f32[32,384], index: 3, kind: input, shape index: {}]   ;;  %s3292_s4 = inlined_call_operand.vmem [shape: f32[8,128], index: 4, kind: input, shape index: {}]   ;;  %s3293_s5 = inlined_call_operand.vmem [shape: f32[1,128], index: 5, kind: output, shape index: {}]  }
   0x1   :  { %s21_s20 = sshll.u32 %s3291_s3, 4  ;;  %s23_s22 = sshll.u32 %s2525_s21, 4  ;;  %s22_s20 = int_to_ptr.hbm [resolvable:$true] %s21_s20  ;;  %s24_s22 = int_to_ptr.vmem [resolvable:$true] %s23_s22 }
   0x2   :  { %s2527_s24 = smov 24  }
   0x3   :  { %29 = dma.hbm_to_vmem [thread:$0]  %s22_s20, 1536, %s24_s22, [#allocation3], %s2526_s23, %s2526_s23, %s2527_s24  }
   0x4   :  { %2523 = dma.done.wait [#allocation3], 1536  }
   0x5   :  { %2524 = vsyncadd [#allocation3], 4294965760  ;;  %v97_v0 = vld [vmem:[#allocation2 + $0x48] sm:$0xff]  ;;  %v96_v1 = vld [vmem:[#allocation2 + $0x30] sm:$0xff]  ;;  %v2528_v6 = vmov -1.0   ;;  %vm111_vm1 = vcmask 261120   ;;  %v38_v13 = vlaneseq }
   0x6   :  { %127 = vmatpush.msra.mxu2 %v97_v0  ;;  %153 = vmatpush.msra.mxu3 %v97_v0  ;;  %v95_v2 = vld [vmem:[#allocation2 + $0x18] sm:$0xff]  ;;  %v106_v3 = vld [vmem:[%s3292_s4] sm:$0xff]  ;;  %s2529_s30 = smov 32   ;;  %v109_v11 = vld [vmem:[%s3290_s2 + $0x8] sm:$0xf]  ;;  %s2530_s7 = smov 64  }
   0x7   :  { %v2571_v4 = vperm.slane %v106_v3, 2  ;;  %vm164_vm0 = vcmp.ge.f32.partialorder %v106_v3, 0.0  ;;  %v94_v5 = vld [vmem:[#allocation2] sm:$0xff]  ;;  %v2595_v12 = vrot.slane %v106_v3, 2  ;;  %s2531_s8 = smov 96   ;;  %v2605_v15 = vshrl.u32 %v38_v13, 7 }
   0x8   :  { %128 = vmatpush.msra.mxu2 %v96_v1  ;;  %154 = vmatpush.msra.mxu3 %v96_v1  ;;  %v165_v7 = vsel %vm164_vm0, 1.0, %v2528_v6  ;;  %v107_v8 = vld [vmem:[%s3289_s1] sm:$0xff]  ;;  %v2532_v17 = vmov 1.0|1.0   ;;  %v110_v18 = vperm.slane %v106_v3, 0  ;;  %vm880_vm9 = vcmask 1043456  }
   0x9   :  { %v108_v9 = vld [vmem:[%s3290_s2] sm:$0xff]  ;;  %169 = vrot.lane.b32.xlu0 %v2571_v4, %s2529_s30  ;;  %v2581_v10 = vperm.slane %v165_v7, 2  ;;  %546 = vrot.lane.b32.xlu1 %v2595_v12, %s2531_s8  ;;  %v2637_v31 = vadd.s32 8, %v2605_v15  ;;  %vm185_vm10 = vcmask 257024   ;;  %vm422_vm14 = vcmask 1041409  }
   0xa   :  { %129 = vmatpush.msra.mxu2 %v95_v2  ;;  %155 = vmatpush.msra.mxu3 %v95_v2  ;;  %v2602_v14 = vld [vmem:[%s3288_s0] sm:$0xff]  ;;  %vm424_vm15 = vcmask 1042434   ;;  %vm426_vm0 = vcmask 1043459  }
   0xb   :  { %280 = vrot.lane.b32.xlu2 %v2581_v10, %s2529_s30  ;;  %v41_v16 = vperm.slane %v2602_v14, 0  ;;  %v68_v32 = vperm.slane %v2602_v14, 2  ;;  %v76_v33 = vperm.slane %v2602_v14, 3 }
   0xc   :  { %130 = vmatpush.msra.mxu2 %v94_v5  ;;  %156 = vmatpush.msra.mxu3 %v94_v5 }
   0xd   :  { %2341 = vmatmul.msk.f32.vlgmr.msra.gmra.mxu2 %vm111_vm1, %v107_v8  ;;  %2342 = vmatmul.msk.f32.vlgmr.msra.gmra.mxu3 %vm111_vm1, %v108_v9  ;;  %vm42_vm2 = vcmp.eq.s32.totalorder %v41_v16, %v2605_v15  ;;  %vm69_vm4 = vcmp.eq.s32.totalorder %v68_v32, %v2605_v15  ;;  %vm70_vm5 = vcmp.eq.s32.totalorder %v68_v32, %v2637_v31 }
   0xe   :  { %vm2330_vm3 = vmpackc.low %vm42_vm2, %vm42_vm2  ;;  %vm77_vm7 = vcmp.eq.s32.totalorder %v76_v33, %v2605_v15  ;;  %vm3301_vm2 = vcmask 1044484  }
   0xf   :  { %2331 = vmatpush.bf16.xpose.msk.msra.mxu0 %vm2330_vm3, %v2532_v17  ;;  %vm2337_vm6 = vmpackc.low %vm70_vm5, %vm69_vm4  ;;  %vm3300_vm3 = vcmask 1045509   ;;  %vm3299_vm4 = vcmask 1046534   ;;  %vm3298_vm5 = vcmask 1047559  }
  0x10   :  { %2338 = vmatpush.bf16.xpose.msk.msra.mxu1 %vm2337_vm6, %v2532_v17  ;;  %vm2339_vm8 = vmpackc.low %vm77_vm7, %vm77_vm7  ;;  %vm447_vm7 = vcmask 64512  }
  0x11   :  { %535 = vrot.lane.b32.xlu0 %v2571_v4, %s2530_s7 }
  0x15   :  { %2343 = vmatmul.msk.f32.gmra.mxu3 %vm111_vm1, %v109_v11 }
  0x17   :  { %2340 = vmatmul.msk.bf16.vlgmr.msra.gmra.mxu1 %vm2339_vm8, %v2532_v17  ;;  %vm3296_vm8 = vcmask 60416  }
  0x19   :  { %641 = vrot.lane.b32.xlu0 %v2581_v10, %s2530_s7 }
  0x65   :  { %v2644_v34 = vpop.permute.xlu2 %280 }
  0x7b   :  { %v170_v23 = vpop.permute.xlu0 %169  ;;  %v547_v57 = vpop.permute.xlu1 %546 }
  0x83   :  { %v2627_v29 = vpop.permute.xlu0 %535 }
  0x8b   :  { %v2671_v63 = vpop.permute.xlu0 %641 }
  0x90   :  { %v132_v19 = vpop.f32.mrf.mxu2  ;;  %v158_v20 = vpop.f32.mrf.mxu3 }
  0x91   :  { %v133_v21 = vadd.f32 %v132_v19, %v110_v18  ;;  %v159_v22 = vadd.f32 %v158_v20, %v110_v18 }
  0x93   :  { %v2610_v24 = vmul.f32 %v170_v23, %v159_v22  ;;  %550 = vrot.lane.b32.xlu1 %v159_v22, %s2530_s7  ;;  %2344 = vmatpush.xpose.msk.msrb.mxu2 %vm111_vm1, %v133_v21  ;;  %v167_v25 = vmul.f32 %v2571_v4, %v133_v21  ;;  %v2630_v30 = vmul.f32 %v2627_v29, %v133_v21 }
  0x94   :  { %525 = vmatpush.msrb.mxu0 %v133_v21 }
  0x95   :  { %176 = vrot.lane.b32.xlu0 %v2610_v24, %s2531_s8  ;;  %251 = vrot.lane.b32.xlu2 %v167_v25, %s2529_s30  ;;  %v216_v35 = vrot.slane %v2610_v24, 1  ;;  %v226_v37 = vperm.slane %v2610_v24, 0  ;;  %v219_v38 = vrot.slane %v2610_v24, 4  ;;  %v218_v39 = vrot.slane %v2610_v24, 3 }
  0x96   :  { %2345 = vmatmul.msk.f32.vlgmr.msrb.gmra.mxu2 %vm111_vm1, %v2595_v12  ;;  %v222_v51 = vrot.slane %v2610_v24, 7  ;;  %v221_v52 = vrot.slane %v2610_v24, 6  ;;  %v580_v21 = vrot.slane %v2630_v30, 1  ;;  %v217_v33 = vrot.slane %v2610_v24, 2 }
  0x97   :  { %v227_v36 = vperm.slane %v216_v35, 0  ;;  %v230_v45 = vperm.slane %v219_v38, 0  ;;  %v229_v46 = vperm.slane %v218_v39, 0 }
  0x98   :  { %v161_v26 = vpop.f32.mrf.mxu3  ;;  %v233_v55 = vperm.slane %v222_v51, 0  ;;  %v232_v56 = vperm.slane %v221_v52, 0  ;;  %v586_v51 = vrot.slane %v2630_v30, 7  ;;  %v584_v52 = vrot.slane %v2630_v30, 5 }
  0x99   :  { %v162_v27 = vadd.f32 %v161_v26, %v110_v18  ;;  %v2685_v26 = vperm.slane %v580_v21, 0 }
  0x9b   :  { %v2620_v28 = vmul.f32 %v170_v23, %v162_v27  ;;  %603 = vrot.lane.b32.xlu1 %v2610_v24, %s2529_s30 }
  0x9d   :  { %552 = vrot.lane.b32.xlu0 %v162_v27, %s2530_s7  ;;  %605 = vrot.lane.b32.xlu2 %v2620_v28, %s2529_s30  ;;  %v223_v62 = vrot.slane %v2620_v28, 1  ;;  %v234_v3 = vperm.slane %v2620_v28, 0  ;;  %v225_v11 = vrot.slane %v2620_v28, 3 }
  0x9f   :  { %v235_v2 = vperm.slane %v223_v62, 0  ;;  %v237_v22 = vperm.slane %v225_v11, 0 }
  0xa3   :  { %540 = vrot.lane.b32.xlu1 %v2630_v30, %s2529_s30 }
  0xa5   :  { %178 = vrot.lane.b32.xlu2 %v2620_v28, %s2531_s8 }
  0xef   :  { %v2652_v40 = vpop.permute.xlu2 %251 }
  0xf0   :  { %v255_v41 = vadd.f32 %v2652_v40, %v227_v36  ;;  %v254_v42 = vadd.f32 %v2652_v40, %v226_v37  ;;  %v258_v49 = vadd.f32 %v2652_v40, %v230_v45  ;;  %v257_v50 = vadd.f32 %v2652_v40, %v229_v46 }
  0xf1   :  { %v261_v60 = vadd.f32 %v2652_v40, %v233_v55  ;;  %v260_v61 = vadd.f32 %v2652_v40, %v232_v56  ;;  %v263_v7 = vadd.f32 %v2652_v40, %v235_v2  ;;  %v262_v8 = vadd.f32 %v2652_v40, %v234_v3 }
  0xf2   :  { %v267_v43 = vand.u32 2147483647, %v255_v41  ;;  %v266_v44 = vand.u32 2147483647, %v254_v42  ;;  %v270_v53 = vand.u32 2147483647, %v258_v49  ;;  %v265_v27 = vadd.f32 %v2652_v40, %v237_v22 }
  0xf3   :  { %v269_v54 = vand.u32 2147483647, %v257_v50  ;;  %v273_v0 = vand.u32 2147483647, %v261_v60  ;;  %v272_v1 = vand.u32 2147483647, %v260_v61 }
  0xf4   :  { %v284_v47 = vmul.f32 %v2644_v34, %v267_v43  ;;  %v283_v48 = vmul.f32 %v2644_v34, %v266_v44  ;;  %v287_v58 = vmul.f32 %v2644_v34, %v270_v53  ;;  %v275_v19 = vand.u32 2147483647, %v263_v7 }
  0xf5   :  { %v286_v59 = vmul.f32 %v2644_v34, %v269_v54  ;;  %v290_v5 = vmul.f32 %v2644_v34, %v273_v0  ;;  %v289_v6 = vmul.f32 %v2644_v34, %v272_v1  ;;  %v274_v20 = vand.u32 2147483647, %v262_v8 }
  0xf6   :  { %309 = vrot.lane.b32.xlu2 %v284_v47, %s2531_s8  ;;  %307 = vrot.lane.b32.xlu1 %v283_v48, %s2531_s8  ;;  %v292_v23 = vmul.f32 %v2644_v34, %v275_v19  ;;  %v583_v36 = vrot.slane %v2630_v30, 4  ;;  %v581_v37 = vrot.slane %v2630_v30, 2  ;;  %v277_v41 = vand.u32 2147483647, %v265_v27 }
  0xf7   :  { %v291_v25 = vmul.f32 %v2644_v34, %v274_v20  ;;  %v228_v42 = vperm.slane %v217_v33, 0  ;;  %v220_v50 = vrot.slane %v2610_v24, 5  ;;  %v224_v1 = vrot.slane %v2620_v28, 2 }
  0xf8   :  { %v2699_v43 = vperm.slane %v583_v36, 0  ;;  %v2701_v44 = vperm.slane %v581_v37, 0  ;;  %v294_v47 = vmul.f32 %v2644_v34, %v277_v41  ;;  %v587_v8 = vperm.slane %v2630_v30, 0 }
  0xf9   :  { %v256_v45 = vadd.f32 %v2652_v40, %v228_v42  ;;  %v231_v56 = vperm.slane %v220_v50, 0  ;;  %v236_v7 = vperm.slane %v224_v1, 0  ;;  %v582_v19 = vrot.slane %v2630_v30, 3 }
  0xfa   :  { %v585_v33 = vrot.slane %v2630_v30, 6 }
  0xfb   :  { %v268_v53 = vand.u32 2147483647, %v256_v45  ;;  %v259_v60 = vadd.f32 %v2652_v40, %v231_v56  ;;  %v264_v11 = vadd.f32 %v2652_v40, %v236_v7  ;;  %v590_v22 = vperm.slane %v582_v19, 0 }
  0xfc   :  { %v593_v37 = vperm.slane %v585_v33, 0 }
  0xfd   :  { %v285_v24 = vmul.f32 %v2644_v34, %v268_v53  ;;  %v271_v2 = vand.u32 2147483647, %v259_v60  ;;  %v276_v20 = vand.u32 2147483647, %v264_v11 }
  0xfe   :  { %315 = vrot.lane.b32.xlu2 %v287_v58, %s2531_s8  ;;  %313 = vrot.lane.b32.xlu1 %v286_v59, %s2531_s8  ;;  %v2717_v58 = vperm.slane %v586_v51, 0  ;;  %v2719_v59 = vperm.slane %v584_v52, 0 }
 0x105   :  { %v551_v9 = vpop.permute.xlu1 %550 }
 0x106   :  { %321 = vrot.lane.b32.xlu2 %v290_v5, %s2531_s8  ;;  %319 = vrot.lane.b32.xlu1 %v289_v6, %s2531_s8  ;;  %v606_v6 = vpop.permute.xlu2 %605 }
 0x107   :  { %v177_v16 = vpop.permute.xlu0 %176  ;;  %v610_v28 = vadd.f32 %v606_v6, %v587_v8  ;;  %v616_v27 = vadd.f32 %v606_v6, %v590_v22  ;;  %v622_v41 = vadd.f32 %v606_v6, %v593_v37  ;;  %v612_v50 = vadd.f32 %v606_v6, %v2685_v26 }
 0x108   :  { %v182_v18 = vsel %vm111_vm1, %v177_v16, 0.0 }
 0x109   :  { %183 = vadd.xlane.f32.xlu0 %v182_v18  ;;  %v626_v21 = vand.u32 2147483647, %v610_v28  ;;  %v632_v36 = vand.u32 2147483647, %v616_v27  ;;  %v638_v45 = vand.u32 2147483647, %v622_v41 }
 0x10a   :  { %v628_v51 = vand.u32 2147483647, %v612_v50 }
 0x10c   :  { %v647_v53 = vmul.f32 %v2671_v63, %v628_v51 }
 0x10d   :  { %v2688_v32 = vpop.permute.xlu1 %603 }
 0x10e   :  { %325 = vrot.lane.b32.xlu2 %v292_v23, %s2531_s8  ;;  %323 = vrot.lane.b32.xlu1 %v291_v25, %s2531_s8  ;;  %v611_v35 = vadd.f32 %v2688_v32, %v2685_v26  ;;  %v617_v48 = vadd.f32 %v2688_v32, %v2699_v43  ;;  %v613_v49 = vadd.f32 %v2688_v32, %v2701_v44  ;;  %v179_v52 = vpop.permute.xlu2 %178 }
 0x10f   :  { %v553_v38 = vpop.permute.xlu0 %552  ;;  %v623_v0 = vadd.f32 %v2688_v32, %v2717_v58  ;;  %v293_v23 = vmul.f32 %v2644_v34, %v276_v20  ;;  %v609_v40 = vadd.f32 %v2688_v32, %v587_v8  ;;  %v645_v25 = vmul.f32 %v2671_v63, %v626_v21 }
 0x110   :  { %2348 = vmatpush.xpose.msk.msrb.mxu1 %vm111_vm1, %v553_v38  ;;  %2351 = vmatpush.msk.msra.mxu2 %vm880_vm9, %v553_v38  ;;  %v627_v39 = vand.u32 2147483647, %v611_v35  ;;  %v633_v54 = vand.u32 2147483647, %v617_v48  ;;  %v629_v55 = vand.u32 2147483647, %v613_v49  ;;  %v621_v30 = vadd.f32 %v2688_v32, %v593_v37 }
 0x111   :  { %v639_v3 = vand.u32 2147483647, %v623_v0  ;;  %v625_v35 = vand.u32 2147483647, %v609_v40  ;;  %v620_v0 = vadd.f32 %v606_v6, %v2719_v59 }
 0x112   :  { %898 = vmatpush.msra.mxu2 %v551_v9  ;;  %v646_v46 = vmul.f32 %v2671_v63, %v627_v39  ;;  %v652_v61 = vmul.f32 %v2671_v63, %v633_v54  ;;  %v648_v62 = vmul.f32 %v2671_v63, %v629_v55  ;;  %v615_v39 = vadd.f32 %v2688_v32, %v590_v22 }
 0x113   :  { %v658_v16 = vmul.f32 %v2671_v63, %v639_v3  ;;  %v644_v38 = vmul.f32 %v2671_v63, %v625_v35  ;;  %v637_v48 = vand.u32 2147483647, %v621_v30  ;;  %v186_v54 = vsel %vm185_vm10, %v179_v52, 0.0 }
 0x114   :  { %2349 = vmatpush.xpose.msk.msrb.mxu1 %vm111_vm1, %v551_v9  ;;  %v288_v9 = vmul.f32 %v2644_v34, %v271_v2  ;;  %v651_v34 = vmul.f32 %v2671_v63, %v632_v36  ;;  %v631_v42 = vand.u32 2147483647, %v615_v39  ;;  %v636_v1 = vand.u32 2147483647, %v620_v0 }
 0x115   :  { %v656_v49 = vmul.f32 %v2671_v63, %v637_v48 }
 0x116   :  { %680 = vrot.lane.b32.xlu2 %v646_v46, %s2529_s30  ;;  %329 = vrot.lane.b32.xlu1 %v294_v47, %s2531_s8  ;;  %v650_v46 = vmul.f32 %v2671_v63, %v631_v42  ;;  %v657_v47 = vmul.f32 %v2671_v63, %v638_v45  ;;  %v655_v2 = vmul.f32 %v2671_v63, %v636_v1 }
 0x117   :  { %2350 = vmatmul.msk.f32.vlgmr.msrb.gmra.mxu1 %vm111_vm1, %v547_v57  ;;  %v619_v57 = vadd.f32 %v2688_v32, %v2719_v59  ;;  %v618_v32 = vadd.f32 %v606_v6, %v2699_v43 }
 0x119   :  { %v635_v5 = vand.u32 2147483647, %v619_v57  ;;  %v634_v55 = vand.u32 2147483647, %v618_v32  ;;  %v2773_v57 = vpop.f32.mrf.mxu1 }
 0x11b   :  { %v654_v18 = vmul.f32 %v2671_v63, %v635_v5  ;;  %v653_v56 = vmul.f32 %v2671_v63, %v634_v55 }
 0x11d   :  { %311 = vrot.lane.b32.xlu0 %v285_v24, %s2531_s8  ;;  %v624_v24 = vadd.f32 %v606_v6, %v2717_v58  ;;  %v2776_v58 = vpop.permute.xlu1 %540 }
 0x11e   :  { %692 = vrot.lane.b32.xlu2 %v652_v61, %s2529_s30  ;;  %684 = vrot.lane.b32.xlu1 %v648_v62, %s2529_s30  ;;  %v614_v61 = vadd.f32 %v606_v6, %v2701_v44  ;;  %v46_v6 = vperm.slane %v2602_v14, 1 }
 0x11f   :  { %v640_v26 = vand.u32 2147483647, %v624_v24 }
 0x120   :  { %v630_v43 = vand.u32 2147483647, %v614_v61  ;;  %vm47_vm11 = vcmp.eq.s32.totalorder %v46_v6, %v2605_v15  ;;  %vm48_vm12 = vcmp.eq.s32.totalorder %v46_v6, %v2637_v31 }
 0x121   :  { %v659_v60 = vmul.f32 %v2671_v63, %v640_v26  ;;  %v92_v3 = vpop.f32.mrf.mxu1  ;;  %vm2332_vm13 = vmpackc.low %vm48_vm12, %vm47_vm11  ;;  %vm810_vm12 = vcmask 130112  }
 0x122   :  { %v649_v62 = vmul.f32 %v2671_v63, %v630_v43  ;;  %2333 = vmatmul.msk.bf16.vlgmr.msra.gmra.mxu0 %vm2332_vm13, %v2532_v17  ;;  %vm844_vm13 = vcmask 97280  }
 0x125   :  { %317 = vrot.lane.b32.xlu0 %v288_v9, %s2531_s8 }
 0x126   :  { %704 = vrot.lane.b32.xlu2 %v658_v16, %s2529_s30  ;;  %696 = vrot.lane.b32.xlu1 %v654_v18, %s2529_s30 }
 0x12d   :  { %327 = vrot.lane.b32.xlu0 %v293_v23, %s2531_s8 }
 0x12e   :  { %678 = vrot.lane.b32.xlu1 %v645_v25, %s2529_s30 }
 0x135   :  { %676 = vrot.lane.b32.xlu0 %v644_v38, %s2529_s30 }
 0x136   :  { %690 = vrot.lane.b32.xlu1 %v651_v34, %s2529_s30 }
 0x13d   :  { %688 = vrot.lane.b32.xlu0 %v650_v46, %s2529_s30 }
 0x13e   :  { %702 = vrot.lane.b32.xlu1 %v657_v47, %s2529_s30 }
 0x145   :  { %700 = vrot.lane.b32.xlu0 %v656_v49, %s2529_s30 }
 0x14d   :  { %682 = vrot.lane.b32.xlu0 %v647_v53, %s2529_s30 }
 0x14f   :  { %187 = vadd.xlane.f32.xlu2 %v186_v54 }
 0x150   :  { %v310_v44 = vpop.permute.xlu2 %309 }
 0x151   :  { %v346_v8 = vsel %vm111_vm1, %v310_v44, 0.0 }
 0x155   :  { %694 = vrot.lane.b32.xlu0 %v653_v56, %s2529_s30 }
 0x158   :  { %v316_v59 = vpop.permute.xlu2 %315 }
 0x159   :  { %v355_v37 = vsel %vm111_vm1, %v316_v59, 0.0 }
 0x15d   :  { %706 = vrot.lane.b32.xlu0 %v659_v60, %s2529_s30 }
 0x160   :  { %v322_v28 = vpop.permute.xlu2 %321 }
 0x161   :  { %v364_v42 = vsel %vm111_vm1, %v322_v28, 0.0 }
 0x167   :  { %686 = vrot.lane.b32.xlu2 %v649_v62, %s2529_s30 }
 0x168   :  { %v308_v5 = vpop.permute.xlu1 %307  ;;  %v326_v23 = vpop.permute.xlu2 %325 }
 0x169   :  { %v343_v20 = vsel %vm111_vm1, %v308_v5, 0.0  ;;  %v370_v48 = vsel %vm111_vm1, %v326_v23, 0.0 }
 0x16f   :  { %698 = vrot.lane.b32.xlu2 %v655_v2, %s2529_s30 }
 0x170   :  { %v314_v7 = vpop.permute.xlu1 %313  ;;  %v681_v35 = vpop.permute.xlu2 %680 }
 0x171   :  { %v352_v17 = vsel %vm111_vm1, %v314_v7, 0.0  ;;  %v730_v32 = vsel %vm111_vm1, %v681_v35, 0.0 }
 0x178   :  { %v320_v9 = vpop.permute.xlu1 %319  ;;  %v693_v45 = vpop.permute.xlu2 %692 }
 0x179   :  { %v361_v21 = vsel %vm111_vm1, %v320_v9, 0.0  ;;  %v748_v60 = vsel %vm111_vm1, %v693_v45, 0.0 }
 0x17c   :  { %v2781_v11 = vpop.xlane.xlu0 %183 }
 0x180   :  { %v324_v18 = vpop.permute.xlu1 %323  ;;  %v705_v52 = vpop.permute.xlu2 %704 }
 0x181   :  { %v367_v25 = vsel %vm111_vm1, %v324_v18, 0.0  ;;  %v766_v9 = vsel %vm111_vm1, %v705_v52, 0.0 }
 0x187   :  { %347 = vadd.xlane.f32.xlu0 %v346_v8  ;;  %v543_v8 = vsel %vm111_vm1, %v2776_v58, 0.0 }
 0x188   :  { %v330_v22 = vpop.permute.xlu1 %329 }
 0x189   :  { %v376_v38 = vsel %vm111_vm1, %v330_v22, 0.0 }
 0x18f   :  { %v312_v63 = vpop.permute.xlu0 %311 }
 0x190   :  { %v349_v16 = vsel %vm111_vm1, %v312_v63, 0.0  ;;  %v685_v33 = vpop.permute.xlu1 %684 }
 0x191   :  { %350 = vadd.xlane.f32.xlu1 %v349_v16  ;;  %v736_v46 = vsel %vm111_vm1, %v685_v33, 0.0 }
 0x197   :  { %v318_v19 = vpop.permute.xlu0 %317 }
 0x198   :  { %344 = vadd.xlane.f32.xlu2 %v343_v20  ;;  %v358_v14 = vsel %vm111_vm1, %v318_v19, 0.0  ;;  %v697_v34 = vpop.permute.xlu1 %696 }
 0x199   :  { %362 = vadd.xlane.f32.xlu1 %v361_v21  ;;  %359 = vadd.xlane.f32.xlu0 %v358_v14  ;;  %v754_v49 = vsel %vm111_vm1, %v697_v34, 0.0  ;;  %v2819_v14 = vand.u32 127, %v38_v13 }
 0x19f   :  { %v328_v40 = vpop.permute.xlu0 %327 }
 0x1a0   :  { %353 = vadd.xlane.f32.xlu2 %v352_v17  ;;  %v373_v27 = vsel %vm111_vm1, %v328_v40, 0.0  ;;  %v679_v51 = vpop.permute.xlu1 %678 }
 0x1a1   :  { %368 = vadd.xlane.f32.xlu1 %v367_v25  ;;  %374 = vadd.xlane.f32.xlu0 %v373_v27  ;;  %v727_v54 = vsel %vm185_vm10, %v679_v51, 0.0  ;;  %v213_v27 = vpop.f32.mrf.mxu2 }
 0x1a7   :  { %v677_v36 = vpop.permute.xlu0 %676 }
 0x1a8   :  { %356 = vadd.xlane.f32.xlu2 %v355_v37  ;;  %v724_v39 = vsel %vm111_vm1, %v677_v36, 0.0  ;;  %v691_v24 = vpop.permute.xlu1 %690 }
 0x1a9   :  { %377 = vadd.xlane.f32.xlu1 %v376_v38  ;;  %725 = vadd.xlane.f32.xlu0 %v724_v39  ;;  %v745_v61 = vsel %vm185_vm10, %v691_v24, 0.0  ;;  %v2837_v24 = vpop.f32.mrf.mxu0 }
 0x1aa   :  { %vm3297_vm6 = vcmp.gt.f32.partialorder %v2837_v24, 0.0 }
 0x1af   :  { %v689_v41 = vpop.permute.xlu0 %688 }
 0x1b0   :  { %365 = vadd.xlane.f32.xlu2 %v364_v42  ;;  %v742_v30 = vsel %vm111_vm1, %v689_v41, 0.0  ;;  %v703_v0 = vpop.permute.xlu1 %702  ;;  %v379_v41 = vperm.slane %v213_v27, 0 }
 0x1b1   :  { %737 = vadd.xlane.f32.xlu1 %v736_v46  ;;  %743 = vadd.xlane.f32.xlu0 %v742_v30  ;;  %v763_v3 = vsel %vm185_vm10, %v703_v0, 0.0 }
 0x1b7   :  { %v701_v47 = vpop.permute.xlu0 %700 }
 0x1b8   :  { %371 = vadd.xlane.f32.xlu2 %v370_v48  ;;  %v760_v50 = vsel %vm111_vm1, %v701_v47, 0.0  ;;  %v380_v48 = vadd.f32 %v379_v41, %v2781_v11 }
 0x1b9   :  { %755 = vadd.xlane.f32.xlu1 %v754_v49  ;;  %761 = vadd.xlane.f32.xlu0 %v760_v50 }
 0x1bf   :  { %v683_v53 = vpop.permute.xlu0 %682 }
 0x1c0   :  { %731 = vadd.xlane.f32.xlu2 %v730_v32  ;;  %v733_v55 = vsel %vm185_vm10, %v683_v53, 0.0 }
 0x1c1   :  { %728 = vadd.xlane.f32.xlu1 %v727_v54  ;;  %734 = vadd.xlane.f32.xlu0 %v733_v55  ;;  %v382_v54 = vmul.f32 0.6, %v380_v48 }
 0x1c2   :  { %v2806_v56 = vpop.xlane.xlu2 %187 }
 0x1c7   :  { %v695_v26 = vpop.permute.xlu0 %694 }
 0x1c8   :  { %749 = vadd.xlane.f32.xlu2 %v748_v60  ;;  %v751_v43 = vsel %vm185_vm10, %v695_v26, 0.0 }
 0x1c9   :  { %746 = vadd.xlane.f32.xlu1 %v745_v61  ;;  %752 = vadd.xlane.f32.xlu0 %v751_v43 }
 0x1ca   :  { %v687_v62 = vpop.permute.xlu2 %686 }
 0x1cb   :  { %v739_v2 = vsel %vm185_vm10, %v687_v62, 0.0 }
 0x1cf   :  { %v707_v1 = vpop.permute.xlu0 %706 }
 0x1d0   :  { %740 = vadd.xlane.f32.xlu2 %v739_v2  ;;  %v769_v5 = vsel %vm185_vm10, %v707_v1, 0.0 }
 0x1d1   :  { %764 = vadd.xlane.f32.xlu1 %v763_v3  ;;  %770 = vadd.xlane.f32.xlu0 %v769_v5 }
 0x1d2   :  { %v699_v7 = vpop.permute.xlu2 %698 }
 0x1d3   :  { %v757_v44 = vsel %vm185_vm10, %v699_v7, 0.0  ;;  %v381_v7 = vadd.f32 %v379_v41, %v2806_v56 }
 0x1d8   :  { %758 = vadd.xlane.f32.xlu2 %v757_v44 }
 0x1d9   :  { %544 = vadd.xlane.f32.xlu1 %v543_v8 }
 0x1e0   :  { %767 = vadd.xlane.f32.xlu2 %v766_v9 }
 0x1fa   :  { %v348_v59 = vpop.xlane.xlu0 %347 }
 0x1fb   :  { %v385_v22 = vmul.f32 0.4, %v348_v59 }
 0x1fd   :  { %v411_v17 = vperm.slane %v385_v22, %v2819_v14 }
 0x204   :  { %v351_v6 = vpop.xlane.xlu1 %350 }
 0x205   :  { %v386_v40 = vmul.f32 0.4, %v351_v6 }
 0x207   :  { %v412_v13 = vperm.slane %v386_v40, %v2819_v14 }
 0x20b   :  { %v345_v63 = vpop.xlane.xlu2 %344 }
 0x20c   :  { %v363_v16 = vpop.xlane.xlu1 %362  ;;  %v360_v18 = vpop.xlane.xlu0 %359  ;;  %v384_v19 = vmul.f32 0.4, %v345_v63  ;;  %v383_v63 = vmul.f32 0.6, %v381_v7 }
 0x20d   :  { %v389_v39 = vmul.f32 0.4, %v360_v18  ;;  %v390_v46 = vmul.f32 0.4, %v363_v16  ;;  %v2854_v18 = vpop.f32.mrf.mxu0 }
 0x20e   :  { %v410_v23 = vperm.slane %v384_v19, %v2819_v14  ;;  %vm3294_vm11 = vcmp.gt.f32.partialorder %v2854_v18, 0.0 }
 0x20f   :  { %v415_v47 = vperm.slane %v389_v39, %v2819_v14  ;;  %v416_v53 = vperm.slane %v390_v46, %v2819_v14 }
 0x210   :  { %v423_v33 = vsel %vm422_vm14, %v411_v17, %v410_v23 }
 0x211   :  { %v425_v42 = vsel %vm424_vm15, %v412_v13, %v423_v33 }
 0x213   :  { %v354_v28 = vpop.xlane.xlu2 %353 }
 0x214   :  { %v369_v20 = vpop.xlane.xlu1 %368  ;;  %v375_v21 = vpop.xlane.xlu0 %374  ;;  %v387_v58 = vmul.f32 0.4, %v354_v28 }
 0x215   :  { %v392_v61 = vmul.f32 0.4, %v369_v20  ;;  %v394_v43 = vmul.f32 0.4, %v375_v21 }
 0x216   :  { %v413_v35 = vperm.slane %v387_v58, %v2819_v14 }
 0x217   :  { %v418_v44 = vperm.slane %v392_v61, %v2819_v14  ;;  %v420_v9 = vperm.slane %v394_v43, %v2819_v14 }
 0x218   :  { %v427_v45 = vsel %vm426_vm0, %v413_v35, %v425_v42 }
 0x21b   :  { %v357_v25 = vpop.xlane.xlu2 %356 }
 0x21c   :  { %v388_v36 = vmul.f32 0.4, %v357_v25  ;;  %v378_v37 = vpop.xlane.xlu1 %377  ;;  %v2826_v38 = vpop.xlane.xlu0 %725  ;;  %v2866_v25 = vadd.s32 4294967288, %v2819_v14 }
 0x21d   :  { %v395_v1 = vmul.f32 0.4, %v378_v37  ;;  %v775_v37 = vmul.f32 0.4, %v2826_v38 }
 0x21e   :  { %v414_v34 = vperm.slane %v388_v36, %v2819_v14 }
 0x21f   :  { %v421_v59 = vperm.slane %v395_v1, %v2819_v14  ;;  %v577_v1 = vpop.f32.mrf.mxu1 }
 0x220   :  { %v429_v30 = vsel %vm3301_vm2, %v414_v34, %v427_v45 }
 0x221   :  { %v431_v52 = vsel %vm3300_vm3, %v415_v47, %v429_v30  ;;  %v807_v47 = vperm.slane %v775_v37, %v2819_v14 }
 0x222   :  { %v433_v26 = vsel %vm3299_vm4, %v416_v53, %v431_v52 }
 0x223   :  { %v366_v49 = vpop.xlane.xlu2 %365 }
 0x224   :  { %v391_v50 = vmul.f32 0.4, %v366_v49  ;;  %v738_v51 = vpop.xlane.xlu1 %737  ;;  %v744_v55 = vpop.xlane.xlu0 %743 }
 0x225   :  { %v779_v39 = vmul.f32 0.4, %v738_v51 }
 0x226   :  { %v417_v32 = vperm.slane %v391_v50, %v2819_v14  ;;  %v781_v50 = vmul.f32 0.4, %v744_v55 }
 0x227   :  { %v815_v49 = vperm.slane %v779_v39, %v2819_v14 }
 0x228   :  { %v435_v60 = vsel %vm3298_vm5, %v417_v32, %v433_v26  ;;  %v818_v43 = vperm.slane %v781_v50, %v2819_v14 }
 0x229   :  { %v441_v11 = vadd.f32 %v435_v60, %v382_v54 }
 0x22b   :  { %v372_v62 = vpop.xlane.xlu2 %371  ;;  %v2844_v0 = vsel %vm3297_vm6, %v441_v11, -1e+30 }
 0x22c   :  { %v393_v2 = vmul.f32 0.4, %v372_v62  ;;  %v756_v3 = vpop.xlane.xlu1 %755  ;;  %v448_v5 = vsel %vm447_vm7, %v2844_v0, -inf  ;;  %v762_v16 = vpop.xlane.xlu0 %761 }
 0x22d   :  { %449 = vmax.xlane.f32.xlu2 %v448_v5  ;;  %v785_v26 = vmul.f32 0.4, %v756_v3 }
 0x22e   :  { %v419_v8 = vperm.slane %v393_v2, %v2819_v14 }
 0x22f   :  { %v824_v3 = vperm.slane %v785_v26, %v2819_v14 }
 0x230   :  { %v436_v6 = vsel %vm422_vm14, %v419_v8, %v418_v44 }
 0x231   :  { %v437_v28 = vsel %vm424_vm15, %v420_v9, %v436_v6  ;;  %v787_v9 = vmul.f32 0.4, %v762_v16 }
 0x232   :  { %v438_v19 = vsel %vm426_vm0, %v421_v59, %v437_v28 }
 0x233   :  { %v732_v56 = vpop.xlane.xlu2 %731  ;;  %v442_v20 = vadd.f32 %v438_v19, %v383_v63  ;;  %v772_v63 = vperm.slane %v577_v1, 0 }
 0x234   :  { %v729_v21 = vpop.xlane.xlu1 %728  ;;  %v735_v58 = vpop.xlane.xlu0 %734  ;;  %v777_v27 = vmul.f32 0.4, %v732_v56 }
 0x235   :  { %v2861_v22 = vsel %vm3294_vm11, %v442_v20, -1e+30  ;;  %v776_v33 = vmul.f32 0.4, %v729_v21  ;;  %v778_v35 = vmul.f32 0.4, %v735_v58 }
 0x236   :  { %v452_v23 = vsel %vm3296_vm8, %v2861_v22, -inf  ;;  %v812_v41 = vperm.slane %v777_v27, %v2819_v14  ;;  %vm3295_vm11 = vcmp.gt.f32.partialorder %v2773_v57, 0.0 }
 0x237   :  { %453 = vmax.xlane.f32.xlu0 %v452_v23  ;;  %v809_v42 = vperm.slane %v776_v33, %v2866_v25  ;;  %v813_v45 = vperm.slane %v778_v35, %v2866_v25 }
 0x239   :  { %v811_v38 = vsel %vm810_vm12, %v809_v42, %v807_v47  ;;  %v814_v51 = vsel %vm810_vm12, %v813_v45, %v812_v41 }
 0x23a   :  { %v833_v61 = vsel %vm422_vm14, %v814_v51, %v811_v38 }
 0x23b   :  { %v750_v40 = vpop.xlane.xlu2 %749 }
 0x23c   :  { %v747_v17 = vpop.xlane.xlu1 %746  ;;  %v753_v34 = vpop.xlane.xlu0 %752  ;;  %v783_v52 = vmul.f32 0.4, %v750_v40 }
 0x23d   :  { %v782_v48 = vmul.f32 0.4, %v747_v17  ;;  %v784_v53 = vmul.f32 0.4, %v753_v34  ;;  %v827_v17 = vperm.slane %v787_v9, %v2819_v14 }
 0x23e   :  { %v821_v2 = vperm.slane %v783_v52, %v2819_v14 }
 0x23f   :  { %v819_v60 = vperm.slane %v782_v48, %v2866_v25  ;;  %v822_v5 = vperm.slane %v784_v53, %v2866_v25 }
 0x241   :  { %v820_v8 = vsel %vm810_vm12, %v819_v60, %v818_v43  ;;  %v823_v56 = vsel %vm810_vm12, %v822_v5, %v821_v2 }
 0x243   :  { %v741_v36 = vpop.xlane.xlu2 %740 }
 0x244   :  { %v780_v13 = vmul.f32 0.4, %v741_v36  ;;  %v765_v30 = vpop.xlane.xlu1 %764  ;;  %v771_v44 = vpop.xlane.xlu0 %770 }
 0x245   :  { %v788_v7 = vmul.f32 0.4, %v765_v30  ;;  %v790_v28 = vmul.f32 0.4, %v771_v44 }
 0x246   :  { %v816_v46 = vperm.slane %v780_v13, %v2866_v25 }
 0x247   :  { %v828_v20 = vperm.slane %v788_v7, %v2866_v25  ;;  %v831_v27 = vperm.slane %v790_v28, %v2866_v25 }
 0x248   :  { %v817_v32 = vsel %vm810_vm12, %v816_v46, %v815_v49 }
 0x249   :  { %v834_v62 = vsel %vm424_vm15, %v817_v32, %v833_v61  ;;  %v829_v35 = vsel %vm810_vm12, %v828_v20, %v827_v17 }
 0x24a   :  { %v835_v59 = vsel %vm426_vm0, %v820_v8, %v834_v62 }
 0x24b   :  { %v759_v54 = vpop.xlane.xlu2 %758  ;;  %v836_v40 = vsel %vm3301_vm2, %v823_v56, %v835_v59 }
 0x24c   :  { %v786_v11 = vmul.f32 0.4, %v759_v54  ;;  %v545_v6 = vpop.xlane.xlu1 %544 }
 0x24d   :  { %v773_v23 = vadd.f32 %v772_v63, %v545_v6 }
 0x24e   :  { %v825_v55 = vperm.slane %v786_v11, %v2866_v25 }
 0x24f   :  { %v774_v36 = vmul.f32 0.6, %v773_v23 }
 0x250   :  { %v826_v19 = vsel %vm810_vm12, %v825_v55, %v824_v3 }
 0x251   :  { %v837_v16 = vsel %vm3300_vm3, %v826_v19, %v836_v40 }
 0x252   :  { %v838_v13 = vsel %vm3299_vm4, %v829_v35, %v837_v16  ;;  %v101_v35 = vld [vmem:[#allocation2 + $0x50] sm:$0xff] }
 0x253   :  { %v768_v21 = vpop.xlane.xlu2 %767  ;;  %946 = vmatpush.msra.mxu1 %v101_v35  ;;  %920 = vmatpush.msrb.mxu3 %v101_v35 }
 0x254   :  { %v789_v58 = vmul.f32 0.4, %v768_v21 }
 0x256   :  { %v830_v33 = vperm.slane %v789_v58, %v2819_v14 }
 0x258   :  { %v832_v37 = vsel %vm810_vm12, %v831_v27, %v830_v33  ;;  %v2496_v27 = vld [vmem:[%s3292_s4] sm:$0xff] }
 0x259   :  { %v839_v39 = vsel %vm3298_vm5, %v832_v37, %v838_v13  ;;  %v2926_v33 = vperm.slane %v2496_v27, 3 }
 0x25a   :  { %v841_v34 = vadd.f32 %v839_v39, %v774_v36 }
 0x25c   :  { %v843_v41 = vsel %vm3295_vm11, %v841_v34, -1e+30 }
 0x25d   :  { %v845_v42 = vsel %vm844_vm13, %v843_v41, -inf }
 0x25e   :  { %846 = vmax.xlane.f32.xlu1 %v845_v42 }
 0x2a0   :  { %v450_v45 = vpop.xlane.xlu2 %449 }
 0x2a1   :  { %v455_v46 = vsub.f32 %v2844_v0, %v450_v45 }
 0x2a3   :  { %v457_v30 = vmul.f32 1.442695, %v455_v46 }
 0x2a5   :  { %2472 = vpow2.f32 %v457_v30 }
 0x2aa   :  { %v454_v47 = vpop.xlane.xlu0 %453 }
 0x2ab   :  { %v2473_v48 = vpop.eup %2472  ;;  %v456_v49 = vsub.f32 %v2861_v22, %v454_v47 }
 0x2ac   :  { %v461_v50 = vmul.f32 %v2473_v48, %v2837_v24 }
 0x2ad   :  { %v459_v38 = vmul.f32 1.442695, %v456_v49 }
 0x2ae   :  { %v463_v51 = vsel %vm447_vm7, %v461_v50, 0.0 }
 0x2af   :  { %2474 = vpow2.f32 %v459_v38  ;;  %464 = vadd.xlane.f32.xlu2 %v463_v51  ;;  %v99_v38 = vld [vmem:[#allocation2 + $0x20] sm:$0xff]  ;;  %v98_v51 = vld [vmem:[#allocation2 + $0x8] sm:$0xff] }
 0x2b5   :  { %v2475_v52 = vpop.eup %2474 }
 0x2b6   :  { %v462_v53 = vmul.f32 %v2475_v52, %v2854_v18 }
 0x2b8   :  { %v466_v32 = vsel %vm3296_vm8, %v462_v53, 0.0 }
 0x2b9   :  { %467 = vadd.xlane.f32.xlu0 %v466_v32 }
 0x2c7   :  { %874 = vrot.lane.b32.xlu2 %v2926_v33, %s2531_s8 }
 0x2cd   :  { %977 = vrot.lane.b32.xlu0 %v2595_v12, %s2530_s7 }
 0x2cf   :  { %1066 = vrot.lane.b32.xlu2 %v2581_v10, %s2531_s8 }
 0x2d1   :  { %v847_v0 = vpop.xlane.xlu1 %846 }
 0x2d2   :  { %v848_v54 = vsub.f32 %v843_v41, %v847_v0 }
 0x2d4   :  { %v849_v26 = vmul.f32 1.442695, %v848_v54 }
 0x2d6   :  { %2476 = vpow2.f32 %v849_v26 }
 0x2dc   :  { %v2477_v22 = vpop.eup %2476 }
 0x2dd   :  { %v2913_v60 = vmul.f32 %v2477_v22, %v2773_v57 }
 0x2df   :  { %v852_v11 = vsel %vm844_vm13, %v2913_v60, 0.0 }
 0x2e0   :  { %853 = vadd.xlane.f32.xlu1 %v852_v11 }
 0x2f9   :  { %958 = vrot.lane.b32.xlu1 %v2571_v4, %s2531_s8 }
 0x301   :  { %1316 = vrot.lane.b32.xlu1 %v2595_v12, %s2529_s30 }
 0x322   :  { %v465_v61 = vpop.xlane.xlu2 %464 }
 0x323   :  { %vm469_vm11 = vcmp.gt.f32.partialorder %v465_v61, 0.0 }
 0x324   :  { %v471_v43 = vsel %vm469_vm11, %v465_v61, 1.0 }
 0x325   :  { %2478 = vrcp.f32 %v471_v43  ;;  %v484_v7 = vand.u32 2147483648, %v471_v43  ;;  %v482_v3 = vand.u32 2147483647, %v471_v43  ;;  %vm478_vm5 = vweird.f32 %v471_v43 }
 0x327   :  { %v485_v9 = vor.u32 1.1754944e-38, %v484_v7  ;;  %vm483_vm3 = vcmp.eq.f32.partialorder %v482_v3, 8.507059e+37 }
 0x32a   :  { %v875_v22 = vpop.permute.xlu2 %874 }
 0x32b   :  { %v2479_v62 = vpop.eup %2478 }
 0x32c   :  { %v474_v55 = vmul.f32 %v2479_v62, %v471_v43  ;;  %v468_v1 = vpop.xlane.xlu0 %467  ;;  %vm479_vm6 = vweird.f32 %v2479_v62  ;;  %v904_v43 = vperm.slane %v2496_v27, 1 }
 0x32d   :  { %vm470_vm8 = vcmp.gt.f32.partialorder %v468_v1, 0.0  ;;  %vm480_vm4 = vmor %vm478_vm5, %vm479_vm6 }
 0x32e   :  { %v475_v2 = vsub.f32 1.0, %v474_v55  ;;  %v472_v5 = vsel %vm470_vm8, %v468_v1, 1.0 }
 0x32f   :  { %2480 = vrcp.f32 %v472_v5  ;;  %v499_v56 = vand.u32 2147483648, %v472_v5  ;;  %v497_v21 = vand.u32 2147483647, %v472_v5  ;;  %vm493_vm11 = vweird.f32 %v472_v5 }
 0x330   :  { %v476_v44 = vmul.f32 %v2479_v62, %v475_v2 }
 0x331   :  { %v500_v58 = vor.u32 1.1754944e-38, %v499_v56  ;;  %vm498_vm5 = vcmp.eq.f32.partialorder %v497_v21, 8.507059e+37 }
 0x332   :  { %v477_v8 = vadd.f32 %v2479_v62, %v476_v44 }
 0x334   :  { %v481_v12 = vsel %vm480_vm4, %v2479_v62, %v477_v8 }
 0x335   :  { %v2481_v59 = vpop.eup %2480  ;;  %v486_v6 = vsel %vm483_vm3, %v485_v9, %v481_v12 }
 0x336   :  { %v489_v63 = vmul.f32 %v2481_v59, %v472_v5  ;;  %v487_v28 = vmul.f32 %v486_v6, %v461_v50  ;;  %vm494_vm8 = vweird.f32 %v2481_v59  ;;  %v100_v50 = vld [vmem:[#allocation2 + $0x38] sm:$0xff] }
 0x337   :  { %vm495_vm2 = vmor %vm493_vm11, %vm494_vm8  ;;  %947 = vmatpush.msra.mxu1 %v100_v50  ;;  %921 = vmatpush.msrb.mxu3 %v100_v50  ;;  %vm3303_vm11 = vcmask 1045509  }
 0x338   :  { %v490_v19 = vsub.f32 1.0, %v489_v63  ;;  %2346 = vmatmul.msk.f32.vlgmr.msrb.gmra.mxu0 %vm447_vm7, %v487_v28 }
 0x339   :  { %948 = vmatpush.msra.mxu1 %v99_v38  ;;  %922 = vmatpush.msrb.mxu3 %v99_v38 }
 0x33a   :  { %v491_v20 = vmul.f32 %v2481_v59, %v490_v19 }
 0x33b   :  { %949 = vmatpush.msra.mxu1 %v98_v51  ;;  %923 = vmatpush.msrb.mxu3 %v98_v51 }
 0x33c   :  { %v492_v23 = vadd.f32 %v2481_v59, %v491_v20 }
 0x33e   :  { %v496_v40 = vsel %vm495_vm2, %v2481_v59, %v492_v23 }
 0x33f   :  { %v501_v17 = vsel %vm498_vm5, %v500_v58, %v496_v40  ;;  %v978_v59 = vpop.permute.xlu0 %977  ;;  %vm3304_vm5 = vcmask 1046534  }
 0x340   :  { %v502_v16 = vmul.f32 %v501_v17, %v462_v53 }
 0x342   :  { %2347 = vmatmul.msk.f32.gmra.mxu0 %vm447_vm7, %v502_v16 }
 0x353   :  { %v854_v36 = vpop.xlane.xlu1 %853 }
 0x354   :  { %vm855_vm2 = vcmp.gt.f32.partialorder %v854_v36, 0.0 }
 0x355   :  { %v856_v37 = vsel %vm855_vm2, %v854_v36, 1.0  ;;  %vm3305_vm2 = vcmask 1047559  }
 0x356   :  { %2482 = vrcp.f32 %v856_v37  ;;  %v868_v41 = vand.u32 2147483648, %v856_v37  ;;  %v866_v45 = vand.u32 2147483647, %v856_v37  ;;  %vm862_vm4 = vweird.f32 %v856_v37 }
 0x358   :  { %v869_v30 = vor.u32 1.1754944e-38, %v868_v41  ;;  %vm867_vm8 = vcmp.eq.f32.partialorder %v866_v45, 8.507059e+37 }
 0x35c   :  { %v2483_v13 = vpop.eup %2482 }
 0x35d   :  { %v858_v39 = vmul.f32 %v2483_v13, %v856_v37  ;;  %vm863_vm3 = vweird.f32 %v2483_v13 }
 0x35e   :  { %vm864_vm6 = vmor %vm862_vm4, %vm863_vm3  ;;  %vm3306_vm3 = vcmp.gt.f32.partialorder %v2837_v24, 0.0 }
 0x35f   :  { %v859_v34 = vsub.f32 1.0, %v858_v39  ;;  %vm3310_vm4 = vmmov %vm3303_vm11 }
 0x361   :  { %v860_v42 = vmul.f32 %v2483_v13, %v859_v34 }
 0x363   :  { %v861_v46 = vadd.f32 %v2483_v13, %v860_v42 }
 0x365   :  { %v865_v47 = vsel %vm864_vm6, %v2483_v13, %v861_v46  ;;  %vm3311_vm6 = vmmov %vm3304_vm5 }
 0x366   :  { %v870_v48 = vsel %vm867_vm8, %v869_v30, %v865_v47  ;;  %vm3312_vm8 = vmmov %vm3305_vm2 }
 0x367   :  { %v871_v49 = vmul.f32 %v870_v48, %v2913_v60 }
 0x369   :  { %2352 = vmatmul.msk.f32.vlgmr.msra.gmra.mxu2 %vm844_vm13, %v871_v49 }
 0x36b   :  { %v959_v55 = vpop.permute.xlu1 %958 }
 0x373   :  { %v1317_v6 = vpop.permute.xlu1 %1316 }
 0x3b5   :  { %v527_v52 = vpop.f32.mrf.mxu0 }
 0x3b6   :  { %v528_v53 = vadd.f32 %v527_v52, %v2926_v33 }
 0x3b8   :  { %v533_v32 = vmax.f32 %v528_v53, 0.0 }
 0x3ba   :  { %2354 = vmatmul.msk.f32.vlgmr.msra.gmra.mxu1 %vm111_vm1, %v533_v32 }
 0x3bf   :  { %v530_v0 = vpop.f32.mrf.mxu0 }
 0x3c0   :  { %v531_v54 = vadd.f32 %v530_v0, %v2926_v33 }
 0x3c2   :  { %v534_v26 = vmax.f32 %v531_v54, 0.0 }
 0x3c4   :  { %2355 = vmatmul.msk.f32.gmra.mxu1 %vm111_vm1, %v534_v26 }
 0x3ec   :  { %v900_v60 = vpop.f32.mrf.mxu2 }
 0x3ed   :  { %v901_v11 = vadd.f32 %v900_v60, %v875_v22 }
 0x3ef   :  { %v903_v61 = vmax.f32 %v901_v11, 0.0 }
 0x3f1   :  { %2353 = vmatmul.msk.f32.vlgmr.msrb.gmra.mxu3 %vm111_vm1, %v903_v61 }
 0x437   :  { %v951_v62 = vpop.f32.mrf.mxu1 }
 0x438   :  { %v952_v1 = vadd.f32 %v951_v62, %v904_v43 }
 0x43a   :  { %v2939_v2 = vmul.f32 %v959_v55, %v952_v1  ;;  %1320 = vrot.lane.b32.xlu2 %v952_v1, %s2530_s7 }
 0x43c   :  { %1373 = vrot.lane.b32.xlu1 %v2939_v2, %s2529_s30  ;;  %965 = vrot.lane.b32.xlu0 %v2939_v2, %s2531_s8 }
 0x441   :  { %v954_v5 = vpop.f32.mrf.mxu1 }
 0x442   :  { %v955_v7 = vadd.f32 %v954_v5, %v904_v43 }
 0x444   :  { %v2946_v44 = vmul.f32 %v959_v55, %v955_v7  ;;  %1322 = vrot.lane.b32.xlu0 %v955_v7, %s2530_s7 }
 0x446   :  { %967 = vrot.lane.b32.xlu2 %v2946_v44, %s2531_s8 }
 0x44c   :  { %1375 = vrot.lane.b32.xlu0 %v2946_v44, %s2529_s30 }
 0x474   :  { %v925_v3 = vpop.f32.mrf.mxu3 }
 0x475   :  { %v926_v8 = vadd.f32 %v925_v3, %v904_v43 }
 0x477   :  { %v2954_v9 = vmul.f32 %v926_v8, %v2571_v4  ;;  %2356 = vmatpush.xpose.msk.msrb.mxu2 %vm111_vm1, %v926_v8  ;;  %1300 = vmatpush.msra.mxu3 %v926_v8  ;;  %v957_v12 = vmul.f32 %v926_v8, %v2627_v29  ;;  %v2964_v4 = vpop.permute.xlu2 %1066 }
 0x479   :  { %1310 = vrot.lane.b32.xlu2 %v2954_v9, %s2529_s30  ;;  %1039 = vrot.lane.b32.xlu0 %v957_v12, %s2529_s30  ;;  %v1351_v63 = vrot.slane %v2954_v9, 2  ;;  %v1350_v28 = vrot.slane %v2954_v9, 1  ;;  %v1353_v20 = vrot.slane %v2954_v9, 4  ;;  %v1354_v13 = vrot.slane %v2954_v9, 5 }
 0x47a   :  { %2357 = vmatmul.msk.f32.vlgmr.msrb.gmra.mxu2 %vm111_vm1, %v978_v59  ;;  %v1357_v30 = vperm.slane %v2954_v9, 0  ;;  %v1355_v47 = vrot.slane %v2954_v9, 6  ;;  %v1352_v51 = vrot.slane %v2954_v9, 3  ;;  %v1356_v11 = vrot.slane %v2954_v9, 7 }
 0x47b   :  { %v1359_v19 = vperm.slane %v1351_v63, 0  ;;  %v1358_v56 = vperm.slane %v1350_v28, 0  ;;  %v1361_v27 = vperm.slane %v1353_v20, 0  ;;  %v1362_v42 = vperm.slane %v1354_v13, 0 }
 0x47c   :  { %v1363_v53 = vperm.slane %v1355_v47, 0  ;;  %v1360_v60 = vperm.slane %v1352_v51, 0  ;;  %v1364_v1 = vperm.slane %v1356_v11, 0 }
 0x494   :  { %v1321_v41 = vpop.permute.xlu2 %1320 }
 0x4ae   :  { %v1374_v29 = vpop.permute.xlu1 %1373  ;;  %v966_v21 = vpop.permute.xlu0 %965 }
 0x4af   :  { %v971_v23 = vsel %vm111_vm1, %v966_v21, 0.0  ;;  %v1383_v58 = vadd.f32 %v1374_v29, %v1359_v19  ;;  %v1381_v40 = vadd.f32 %v1374_v29, %v1358_v56  ;;  %v1387_v37 = vadd.f32 %v1374_v29, %v1361_v27 }
 0x4b0   :  { %972 = vadd.xlane.f32.xlu2 %v971_v23  ;;  %v1389_v46 = vadd.f32 %v1374_v29, %v1362_v42  ;;  %v1379_v49 = vadd.f32 %v1374_v29, %v1357_v30  ;;  %v1391_v26 = vadd.f32 %v1374_v29, %v1363_v53  ;;  %v1385_v43 = vadd.f32 %v1374_v29, %v1360_v60 }
 0x4b1   :  { %v1399_v17 = vand.u32 2147483647, %v1383_v58  ;;  %v1397_v16 = vand.u32 2147483647, %v1381_v40  ;;  %v1403_v34 = vand.u32 2147483647, %v1387_v37  ;;  %v1393_v8 = vadd.f32 %v1374_v29, %v1364_v1 }
 0x4b2   :  { %v1405_v50 = vand.u32 2147483647, %v1389_v46  ;;  %v1395_v32 = vand.u32 2147483647, %v1379_v49  ;;  %v1407_v62 = vand.u32 2147483647, %v1391_v26 }
 0x4b3   :  { %v1415_v35 = vmul.f32 %v1399_v17, %v2581_v10  ;;  %v1413_v36 = vmul.f32 %v1397_v16, %v2581_v10  ;;  %v1419_v45 = vmul.f32 %v1403_v34, %v2581_v10  ;;  %v1401_v5 = vand.u32 2147483647, %v1385_v43 }
 0x4b4   :  { %v1421_v0 = vmul.f32 %v1405_v50, %v2581_v10  ;;  %v1411_v61 = vmul.f32 %v1395_v32, %v2581_v10  ;;  %v1423_v7 = vmul.f32 %v1407_v62, %v2581_v10  ;;  %v1004_v34 = vrot.slane %v2939_v2, 1 }
 0x4b5   :  { %1451 = vrot.lane.b32.xlu1 %v1415_v35, %s2529_s30  ;;  %1447 = vrot.lane.b32.xlu0 %v1413_v36, %s2529_s30  ;;  %v1417_v9 = vmul.f32 %v1401_v5, %v2581_v10  ;;  %v1010_v43 = vrot.slane %v2939_v2, 7  ;;  %v1009_v62 = vrot.slane %v2939_v2, 6 }
 0x4b6   :  { %v1323_v39 = vpop.permute.xlu0 %1322  ;;  %v1015_v46 = vperm.slane %v1004_v34, 0 }
 0x4b7   :  { %2360 = vmatpush.xpose.msk.msra.mxu0 %vm111_vm1, %v1323_v39  ;;  %2363 = vmatpush.msk.msra.mxu2 %vm880_vm9, %v1323_v39  ;;  %v1005_v39 = vrot.slane %v2939_v2, 2 }
 0x4b9   :  { %1659 = vmatpush.msra.mxu2 %v1321_v41 }
 0x4bb   :  { %2361 = vmatpush.xpose.msk.msra.mxu0 %vm111_vm1, %v1321_v41  ;;  %v1008_v41 = vrot.slane %v2939_v2, 5 }
 0x4bd   :  { %1459 = vrot.lane.b32.xlu1 %v1419_v45, %s2529_s30  ;;  %v1016_v45 = vperm.slane %v1005_v39, 0 }
 0x4be   :  { %2362 = vmatmul.msk.f32.vlgmr.msra.gmra.mxu0 %vm111_vm1, %v1317_v6  ;;  %v1376_v48 = vpop.permute.xlu0 %1375  ;;  %v1409_v6 = vand.u32 2147483647, %v1393_v8  ;;  %v1020_v8 = vperm.slane %v1009_v62, 0 }
 0x4bf   :  { %v1384_v38 = vadd.f32 %v1376_v48, %v1359_v19  ;;  %v1388_v22 = vadd.f32 %v1376_v48, %v1361_v27  ;;  %v1390_v12 = vadd.f32 %v1376_v48, %v1362_v42  ;;  %v1382_v59 = vadd.f32 %v1376_v48, %v1358_v56 }
 0x4c0   :  { %v1425_v19 = vmul.f32 %v1409_v6, %v2581_v10  ;;  %v1392_v21 = vadd.f32 %v1376_v48, %v1363_v53  ;;  %v1380_v23 = vadd.f32 %v1376_v48, %v1357_v30  ;;  %v1394_v16 = vadd.f32 %v1376_v48, %v1364_v1 }
 0x4c1   :  { %v1400_v52 = vand.u32 2147483647, %v1384_v38  ;;  %v1404_v55 = vand.u32 2147483647, %v1388_v22  ;;  %v1406_v63 = vand.u32 2147483647, %v1390_v12  ;;  %v1386_v27 = vadd.f32 %v1376_v48, %v1360_v60 }
 0x4c2   :  { %v1398_v28 = vand.u32 2147483647, %v1382_v59  ;;  %v1408_v58 = vand.u32 2147483647, %v1392_v21  ;;  %v1396_v40 = vand.u32 2147483647, %v1380_v23 }
 0x4c3   :  { %v1416_v54 = vmul.f32 %v1400_v52, %v2581_v10  ;;  %v1420_v3 = vmul.f32 %v1404_v55, %v2581_v10  ;;  %v1422_v20 = vmul.f32 %v1406_v63, %v2581_v10  ;;  %v1410_v35 = vand.u32 2147483647, %v1394_v16 }
 0x4c4   :  { %v1414_v29 = vmul.f32 %v1398_v28, %v2581_v10  ;;  %v1424_v56 = vmul.f32 %v1408_v58, %v2581_v10  ;;  %v1412_v17 = vmul.f32 %v1396_v40, %v2581_v10  ;;  %v1402_v36 = vand.u32 2147483647, %v1386_v27 }
 0x4c5   :  { %1463 = vrot.lane.b32.xlu1 %v1421_v0, %s2529_s30  ;;  %1453 = vrot.lane.b32.xlu0 %v1416_v54, %s2529_s30  ;;  %v1426_v37 = vmul.f32 %v1410_v35, %v2581_v10  ;;  %v1007_v42 = vrot.slane %v2939_v2, 4  ;;  %v1014_v30 = vperm.slane %v2939_v2, 0  ;;  %v1006_v48 = vrot.slane %v2939_v2, 3 }
 0x4c6   :  { %v1418_v13 = vmul.f32 %v1402_v36, %v2581_v10  ;;  %v1019_v38 = vperm.slane %v1008_v41, 0  ;;  %v1011_v2 = vrot.slane %v2946_v44, 1 }
 0x4c7   :  { %v1018_v51 = vperm.slane %v1007_v42, 0  ;;  %v1017_v54 = vperm.slane %v1006_v48, 0  ;;  %v968_v42 = vpop.permute.xlu2 %967 }
 0x4c8   :  { %1443 = vrot.lane.b32.xlu2 %v1411_v61, %s2529_s30  ;;  %v1023_v23 = vperm.slane %v1011_v2, 0 }
 0x4cd   :  { %1467 = vrot.lane.b32.xlu1 %v1423_v7, %s2529_s30  ;;  %1461 = vrot.lane.b32.xlu0 %v1420_v3, %s2529_s30  ;;  %v1022_v7 = vperm.slane %v2946_v44, 0  ;;  %v1021_v3 = vperm.slane %v1010_v43, 0 }
 0x4d0   :  { %1455 = vrot.lane.b32.xlu2 %v1417_v9, %s2529_s30 }
 0x4d5   :  { %1471 = vrot.lane.b32.xlu1 %v1425_v19, %s2529_s30  ;;  %1465 = vrot.lane.b32.xlu0 %v1422_v20, %s2529_s30 }
 0x4d8   :  { %1449 = vrot.lane.b32.xlu2 %v1414_v29, %s2529_s30 }
 0x4dd   :  { %1469 = vrot.lane.b32.xlu0 %v1424_v56, %s2529_s30  ;;  %1445 = vrot.lane.b32.xlu1 %v1412_v17, %s2529_s30  ;;  %v1012_v17 = vrot.slane %v2946_v44, 2 }
 0x4df   :  { %v1024_v27 = vperm.slane %v1012_v17, 0 }
 0x4e5   :  { %1473 = vrot.lane.b32.xlu0 %v1426_v37, %s2529_s30  ;;  %1457 = vrot.lane.b32.xlu1 %v1418_v13, %s2529_s30  ;;  %v1013_v37 = vrot.slane %v2946_v44, 3 }
 0x4e7   :  { %v1025_v39 = vperm.slane %v1013_v37, 0 }
 0x4eb   :  { %v1040_v47 = vpop.permute.xlu0 %1039 }
 0x4ec   :  { %v1044_v10 = vadd.f32 %v1040_v47, %v1016_v45  ;;  %v1043_v49 = vadd.f32 %v1040_v47, %v1015_v46  ;;  %v1042_v50 = vadd.f32 %v1040_v47, %v1014_v30  ;;  %v1047_v0 = vadd.f32 %v1040_v47, %v1019_v38  ;;  %v3044_v30 = vpop.permute.xlu2 %1310 }
 0x4ed   :  { %v1046_v11 = vadd.f32 %v1040_v47, %v1018_v51  ;;  %v1045_v61 = vadd.f32 %v1040_v47, %v1017_v54  ;;  %v1050_v59 = vadd.f32 %v1040_v47, %v1022_v7  ;;  %v1049_v6 = vadd.f32 %v1040_v47, %v1021_v3 }
 0x4ee   :  { %v1056_v52 = vand.u32 2147483647, %v1044_v10  ;;  %v1055_v53 = vand.u32 2147483647, %v1043_v49  ;;  %v1054_v32 = vand.u32 2147483647, %v1042_v50  ;;  %v1048_v28 = vadd.f32 %v1040_v47, %v1020_v8 }
 0x4ef   :  { %v1059_v55 = vand.u32 2147483647, %v1047_v0  ;;  %v1058_v1 = vand.u32 2147483647, %v1046_v11  ;;  %v1057_v5 = vand.u32 2147483647, %v1045_v61  ;;  %v1051_v56 = vadd.f32 %v1040_v47, %v1023_v23 }
 0x4f0   :  { %v1071_v26 = vmul.f32 %v2964_v4, %v1056_v52  ;;  %v1070_v22 = vmul.f32 %v2964_v4, %v1055_v53  ;;  %v1069_v60 = vmul.f32 %v2964_v4, %v1054_v32  ;;  %v1062_v19 = vand.u32 2147483647, %v1050_v59 }
 0x4f1   :  { %v1074_v12 = vmul.f32 %v2964_v4, %v1059_v55  ;;  %v1073_v9 = vmul.f32 %v2964_v4, %v1058_v1  ;;  %v1072_v63 = vmul.f32 %v2964_v4, %v1057_v5  ;;  %v1061_v20 = vand.u32 2147483647, %v1049_v6 }
 0x4f2   :  { %1097 = vrot.lane.b32.xlu0 %v1071_v26, %s2531_s8  ;;  %1095 = vrot.lane.b32.xlu1 %v1070_v22, %s2531_s8  ;;  %v1060_v21 = vand.u32 2147483647, %v1048_v28  ;;  %v1077_v29 = vmul.f32 %v2964_v4, %v1062_v19  ;;  %v1063_v16 = vand.u32 2147483647, %v1051_v56  ;;  %v1052_v36 = vadd.f32 %v1040_v47, %v1024_v27 }
 0x4f3   :  { %1093 = vrot.lane.b32.xlu2 %v1069_v60, %s2531_s8  ;;  %v1076_v58 = vmul.f32 %v2964_v4, %v1061_v20  ;;  %v1053_v41 = vadd.f32 %v1040_v47, %v1025_v39 }
 0x4f4   :  { %v1075_v40 = vmul.f32 %v2964_v4, %v1060_v21  ;;  %v1078_v35 = vmul.f32 %v2964_v4, %v1063_v16  ;;  %v1064_v13 = vand.u32 2147483647, %v1052_v36 }
 0x4f5   :  { %v1065_v45 = vand.u32 2147483647, %v1053_v41 }
 0x4f6   :  { %v1079_v34 = vmul.f32 %v2964_v4, %v1064_v13 }
 0x4f7   :  { %v1080_v46 = vmul.f32 %v2964_v4, %v1065_v45 }
 0x4fa   :  { %1103 = vrot.lane.b32.xlu0 %v1074_v12, %s2531_s8  ;;  %1101 = vrot.lane.b32.xlu1 %v1073_v9, %s2531_s8 }
 0x4fb   :  { %1099 = vrot.lane.b32.xlu2 %v1072_v63, %s2531_s8 }
 0x502   :  { %1109 = vrot.lane.b32.xlu0 %v1077_v29, %s2531_s8  ;;  %1107 = vrot.lane.b32.xlu1 %v1076_v58, %s2531_s8  ;;  %v974_v58 = vsel %vm185_vm10, %v968_v42, 0.0 }
 0x503   :  { %1105 = vrot.lane.b32.xlu2 %v1075_v40, %s2531_s8 }
 0x50b   :  { %1111 = vrot.lane.b32.xlu2 %v1078_v35, %s2531_s8 }
 0x513   :  { %1113 = vrot.lane.b32.xlu2 %v1079_v34, %s2531_s8 }
 0x51b   :  { %1115 = vrot.lane.b32.xlu2 %v1080_v46, %s2531_s8 }
 0x523   :  { %v3047_v48 = vpop.xlane.xlu2 %972 }
 0x527   :  { %v1452_v10 = vpop.permute.xlu1 %1451  ;;  %v1448_v47 = vpop.permute.xlu0 %1447 }
 0x528   :  { %v1503_v44 = vsel %vm111_vm1, %v1452_v10, 0.0  ;;  %v1497_v11 = vsel %vm111_vm1, %v1448_v47, 0.0 }
 0x52b   :  { %v1444_v49 = vpop.permute.xlu2 %1443 }
 0x52c   :  { %1504 = vadd.xlane.f32.xlu0 %v1503_v44  ;;  %v1491_v50 = vsel %vm111_vm1, %v1444_v49, 0.0 }
 0x52d   :  { %1492 = vadd.xlane.f32.xlu1 %v1491_v50  ;;  %v1313_v50 = vsel %vm111_vm1, %v3044_v30, 0.0 }
 0x52f   :  { %v1460_v38 = vpop.permute.xlu1 %1459 }
 0x530   :  { %v1515_v52 = vsel %vm111_vm1, %v1460_v38, 0.0 }
 0x533   :  { %v1456_v51 = vpop.permute.xlu2 %1455 }
 0x534   :  { %1516 = vadd.xlane.f32.xlu0 %v1515_v52  ;;  %v1509_v4 = vsel %vm111_vm1, %v1456_v51, 0.0 }
 0x535   :  { %1510 = vadd.xlane.f32.xlu1 %v1509_v4 }
 0x537   :  { %v1464_v53 = vpop.permute.xlu1 %1463  ;;  %v1454_v32 = vpop.permute.xlu0 %1453 }
 0x538   :  { %v1521_v54 = vsel %vm111_vm1, %v1464_v53, 0.0  ;;  %v1506_v62 = vsel %vm185_vm10, %v1454_v32, 0.0 }
 0x53b   :  { %v1450_v0 = vpop.permute.xlu2 %1449 }
 0x53c   :  { %1522 = vadd.xlane.f32.xlu0 %v1521_v54  ;;  %v1500_v26 = vsel %vm185_vm10, %v1450_v0, 0.0 }
 0x53d   :  { %1501 = vadd.xlane.f32.xlu1 %v1500_v26 }
 0x53f   :  { %v1468_v22 = vpop.permute.xlu1 %1467  ;;  %v1462_v60 = vpop.permute.xlu0 %1461 }
 0x540   :  { %v1518_v8 = vsel %vm185_vm10, %v1462_v60, 0.0  ;;  %v1527_v45 = vsel %vm111_vm1, %v1468_v22, 0.0 }
 0x544   :  { %1498 = vadd.xlane.f32.xlu2 %v1497_v11 }
 0x547   :  { %v1472_v61 = vpop.permute.xlu1 %1471  ;;  %v1466_v43 = vpop.permute.xlu0 %1465 }
 0x548   :  { %v1524_v63 = vsel %vm185_vm10, %v1466_v43, 0.0  ;;  %v1533_v49 = vsel %vm111_vm1, %v1472_v61, 0.0 }
 0x54c   :  { %1507 = vadd.xlane.f32.xlu2 %v1506_v62 }
 0x54d   :  { %v1094_v55 = vpop.permute.xlu2 %1093 }
 0x54e   :  { %v1129_v1 = vsel %vm111_vm1, %v1094_v55, 0.0 }
 0x54f   :  { %1130 = vadd.xlane.f32.xlu1 %v1129_v1  ;;  %v1446_v5 = vpop.permute.xlu1 %1445  ;;  %v1470_v3 = vpop.permute.xlu0 %1469 }
 0x550   :  { %v1494_v7 = vsel %vm185_vm10, %v1446_v5, 0.0  ;;  %v1530_v39 = vsel %vm185_vm10, %v1470_v3, 0.0 }
 0x551   :  { %1495 = vadd.xlane.f32.xlu0 %v1494_v7 }
 0x554   :  { %1519 = vadd.xlane.f32.xlu2 %v1518_v8 }
 0x555   :  { %v1100_v12 = vpop.permute.xlu2 %1099 }
 0x556   :  { %v1138_v9 = vsel %vm111_vm1, %v1100_v12, 0.0 }
 0x557   :  { %1139 = vadd.xlane.f32.xlu1 %v1138_v9  ;;  %v1458_v59 = vpop.permute.xlu1 %1457  ;;  %v1474_v28 = vpop.permute.xlu0 %1473 }
 0x558   :  { %v1512_v6 = vsel %vm185_vm10, %v1458_v59, 0.0  ;;  %v1536_v44 = vsel %vm185_vm10, %v1474_v28, 0.0  ;;  %vm3302_vm10 = vcmask 1044484  }
 0x559   :  { %1513 = vadd.xlane.f32.xlu0 %v1512_v6 }
 0x55c   :  { %1525 = vadd.xlane.f32.xlu2 %v1524_v63 }
 0x55d   :  { %v1106_v2 = vpop.permute.xlu2 %1105 }
 0x55e   :  { %v1147_v19 = vsel %vm111_vm1, %v1106_v2, 0.0 }
 0x55f   :  { %1148 = vadd.xlane.f32.xlu1 %v1147_v19 }
 0x564   :  { %v1096_v20 = vpop.permute.xlu1 %1095  ;;  %v1098_v21 = vpop.permute.xlu0 %1097 }
 0x565   :  { %v1132_v23 = vsel %vm111_vm1, %v1096_v20, 0.0  ;;  %v1135_v29 = vsel %vm111_vm1, %v1098_v21, 0.0  ;;  %v1112_v40 = vpop.permute.xlu2 %1111 }
 0x566   :  { %1133 = vadd.xlane.f32.xlu0 %v1132_v23  ;;  %1136 = vadd.xlane.f32.xlu2 %v1135_v29  ;;  %v1156_v35 = vsel %vm111_vm1, %v1112_v40, 0.0 }
 0x567   :  { %975 = vadd.xlane.f32.xlu1 %v974_v58 }
 0x56c   :  { %v1102_v56 = vpop.permute.xlu1 %1101  ;;  %v1104_v17 = vpop.permute.xlu0 %1103 }
 0x56d   :  { %v1141_v16 = vsel %vm111_vm1, %v1102_v56, 0.0  ;;  %v1144_v27 = vsel %vm111_vm1, %v1104_v17, 0.0  ;;  %v1114_v36 = vpop.permute.xlu2 %1113 }
 0x56e   :  { %1142 = vadd.xlane.f32.xlu0 %v1141_v16  ;;  %1145 = vadd.xlane.f32.xlu2 %v1144_v27  ;;  %v1159_v34 = vsel %vm111_vm1, %v1114_v36, 0.0 }
 0x56f   :  { %1157 = vadd.xlane.f32.xlu1 %v1156_v35 }
 0x574   :  { %v1108_v37 = vpop.permute.xlu1 %1107  ;;  %v1110_v41 = vpop.permute.xlu0 %1109 }
 0x575   :  { %v1150_v13 = vsel %vm111_vm1, %v1108_v37, 0.0  ;;  %v1116_v42 = vpop.permute.xlu2 %1115  ;;  %v1153_v46 = vsel %vm111_vm1, %v1110_v41, 0.0 }
 0x576   :  { %1151 = vadd.xlane.f32.xlu0 %v1150_v13  ;;  %1531 = vadd.xlane.f32.xlu2 %v1530_v39  ;;  %v1162_v10 = vsel %vm111_vm1, %v1116_v42, 0.0 }
 0x577   :  { %1160 = vadd.xlane.f32.xlu1 %v1159_v34 }
 0x57e   :  { %1528 = vadd.xlane.f32.xlu0 %v1527_v45  ;;  %1154 = vadd.xlane.f32.xlu2 %v1153_v46 }
 0x57f   :  { %1163 = vadd.xlane.f32.xlu1 %v1162_v10  ;;  %v1001_v10 = vpop.f32.mrf.mxu2 }
 0x586   :  { %1534 = vadd.xlane.f32.xlu0 %v1533_v49  ;;  %1537 = vadd.xlane.f32.xlu2 %v1536_v44 }
 0x587   :  { %1314 = vadd.xlane.f32.xlu1 %v1313_v50 }
 0x59f   :  { %v1505_v38 = vpop.xlane.xlu0 %1504 }
 0x5a0   :  { %v1493_v47 = vpop.xlane.xlu1 %1492  ;;  %v1546_v61 = vmul.f32 0.4, %v1505_v38 }
 0x5a1   :  { %v1542_v60 = vmul.f32 0.4, %v1493_v47 }
 0x5a2   :  { %v1580_v8 = vperm.slane %v1546_v61, %v2819_v14 }
 0x5a3   :  { %v1574_v1 = vperm.slane %v1542_v60, %v2819_v14 }
 0x5a7   :  { %v3080_v52 = vpop.xlane.xlu0 %1516 }
 0x5a8   :  { %v1511_v51 = vpop.xlane.xlu1 %1510 }
 0x5a9   :  { %v1548_v28 = vmul.f32 0.4, %v1511_v51 }
 0x5ab   :  { %v1583_v21 = vperm.slane %v1548_v28, %v2819_v14 }
 0x5af   :  { %v3082_v32 = vpop.xlane.xlu0 %1522 }
 0x5b0   :  { %v1502_v53 = vpop.xlane.xlu1 %1501 }
 0x5b1   :  { %v1545_v11 = vmul.f32 0.4, %v1502_v53 }
 0x5b3   :  { %v1578_v5 = vperm.slane %v1545_v11, %v2866_v25 }
 0x5b7   :  { %v1499_v4 = vpop.xlane.xlu2 %1498 }
 0x5b8   :  { %v1544_v54 = vmul.f32 0.4, %v1499_v4  ;;  %v1165_v4 = vperm.slane %v1001_v10, 0 }
 0x5ba   :  { %v1577_v43 = vperm.slane %v1544_v54, %v2819_v14 }
 0x5bc   :  { %v1579_v12 = vsel %vm810_vm12, %v1578_v5, %v1577_v43 }
 0x5bf   :  { %v1508_v0 = vpop.xlane.xlu2 %1507 }
 0x5c0   :  { %v1547_v26 = vmul.f32 0.4, %v1508_v0 }
 0x5c2   :  { %v1131_v22 = vpop.xlane.xlu1 %1130  ;;  %v1581_v55 = vperm.slane %v1547_v26, %v2866_v25 }
 0x5c3   :  { %v1170_v27 = vmul.f32 0.4, %v1131_v22  ;;  %v1166_v22 = vadd.f32 %v1165_v4, %v3047_v48 }
 0x5c4   :  { %v1496_v30 = vpop.xlane.xlu0 %1495  ;;  %v1582_v59 = vsel %vm810_vm12, %v1581_v55, %v1580_v8 }
 0x5c5   :  { %v1543_v62 = vmul.f32 0.4, %v1496_v30  ;;  %v1194_v39 = vperm.slane %v1170_v27, %v2819_v14 }
 0x5c7   :  { %v1575_v7 = vperm.slane %v1543_v62, %v2866_v25  ;;  %v1520_v3 = vpop.xlane.xlu2 %1519 }
 0x5c9   :  { %v1576_v9 = vsel %vm810_vm12, %v1575_v7, %v1574_v1  ;;  %v1168_v1 = vmul.f32 0.6, %v1166_v22 }
 0x5ca   :  { %v1598_v6 = vsel %vm422_vm14, %v1579_v12, %v1576_v9  ;;  %v1140_v63 = vpop.xlane.xlu1 %1139  ;;  %v1551_v9 = vmul.f32 0.4, %v1520_v3 }
 0x5cb   :  { %v1599_v2 = vsel %vm424_vm15, %v1582_v59, %v1598_v6  ;;  %v1173_v41 = vmul.f32 0.4, %v1140_v63 }
 0x5cc   :  { %v1514_v19 = vpop.xlane.xlu0 %1513  ;;  %v1587_v27 = vperm.slane %v1551_v9, %v2866_v25 }
 0x5cd   :  { %v1549_v20 = vmul.f32 0.4, %v1514_v19  ;;  %v1197_v38 = vperm.slane %v1173_v41, %v2819_v14 }
 0x5cf   :  { %v1584_v23 = vperm.slane %v1549_v20, %v2866_v25  ;;  %v1526_v58 = vpop.xlane.xlu2 %1525 }
 0x5d0   :  { %v1553_v28 = vmul.f32 0.4, %v1526_v58 }
 0x5d1   :  { %v1585_v29 = vsel %vm810_vm12, %v1584_v23, %v1583_v21  ;;  %v1550_v21 = vmul.f32 0.4, %v3080_v52 }
 0x5d2   :  { %v3099_v40 = vsel %vm426_vm0, %v1585_v29, %v1599_v2  ;;  %v1149_v56 = vpop.xlane.xlu1 %1148 }
 0x5d3   :  { %v1176_v54 = vmul.f32 0.4, %v1149_v56 }
 0x5d5   :  { %v1200_v62 = vperm.slane %v1176_v54, %v2819_v14 }
 0x5d9   :  { %v1137_v17 = vpop.xlane.xlu2 %1136  ;;  %v1134_v16 = vpop.xlane.xlu0 %1133 }
 0x5da   :  { %v976_v35 = vpop.xlane.xlu1 %975  ;;  %v1171_v36 = vmul.f32 0.4, %v1134_v16  ;;  %v1172_v37 = vmul.f32 0.4, %v1137_v17  ;;  %v1552_v17 = vmul.f32 0.4, %v3082_v32 }
 0x5db   :  { %v1167_v23 = vadd.f32 %v1165_v4, %v976_v35 }
 0x5dc   :  { %v1195_v13 = vperm.slane %v1171_v36, %v2819_v14  ;;  %v1196_v34 = vperm.slane %v1172_v37, %v2819_v14  ;;  %v1347_v37 = vpop.f32.mrf.mxu0 }
 0x5de   :  { %v1206_v42 = vsel %vm422_vm14, %v1195_v13, %v1194_v39  ;;  %v1590_v13 = vperm.slane %v1553_v28, %v2866_v25  ;;  %v1586_v39 = vperm.slane %v1550_v21, %v2819_v14 }
 0x5df   :  { %v1207_v47 = vsel %vm424_vm15, %v1196_v34, %v1206_v42  ;;  %v1169_v34 = vmul.f32 0.6, %v1167_v23  ;;  %v1589_v42 = vperm.slane %v1552_v17, %v2819_v14 }
 0x5e0   :  { %v1208_v0 = vsel %vm426_vm0, %v1197_v38, %v1207_v47  ;;  %v1588_v10 = vsel %vm810_vm12, %v1587_v27, %v1586_v39 }
 0x5e1   :  { %v1146_v45 = vpop.xlane.xlu2 %1145  ;;  %v1143_v46 = vpop.xlane.xlu0 %1142  ;;  %v1591_v38 = vsel %vm810_vm12, %v1590_v13, %v1589_v42 }
 0x5e2   :  { %v1158_v49 = vpop.xlane.xlu1 %1157  ;;  %v1175_v44 = vmul.f32 0.4, %v1146_v45  ;;  %v1174_v50 = vmul.f32 0.4, %v1143_v46  ;;  %v1539_v46 = vperm.slane %v1347_v37, 0 }
 0x5e3   :  { %v1179_v12 = vmul.f32 0.4, %v1158_v49 }
 0x5e4   :  { %v1198_v51 = vperm.slane %v1174_v50, %v2819_v14  ;;  %v1199_v53 = vperm.slane %v1175_v44, %v2819_v14 }
 0x5e5   :  { %v1203_v3 = vperm.slane %v1179_v12, %v2819_v14 }
 0x5e6   :  { %v1209_v26 = vsel %vm3302_vm10, %v1198_v51, %v1208_v0 }
 0x5e7   :  { %v1210_v61 = vsel %vm3303_vm11, %v1199_v53, %v1209_v26 }
 0x5e8   :  { %v1211_v5 = vsel %vm3304_vm5, %v1200_v62, %v1210_v61 }
 0x5e9   :  { %v1532_v60 = vpop.xlane.xlu2 %1531  ;;  %v1152_v11 = vpop.xlane.xlu0 %1151 }
 0x5ea   :  { %v1161_v30 = vpop.xlane.xlu1 %1160  ;;  %v1177_v43 = vmul.f32 0.4, %v1152_v11  ;;  %v1555_v36 = vmul.f32 0.4, %v1532_v60 }
 0x5eb   :  { %v1180_v59 = vmul.f32 0.4, %v1161_v30 }
 0x5ec   :  { %v1201_v55 = vperm.slane %v1177_v43, %v2819_v14  ;;  %v1593_v49 = vperm.slane %v1555_v36, %v2866_v25 }
 0x5ed   :  { %v1204_v58 = vperm.slane %v1180_v59, %v2819_v14 }
 0x5ee   :  { %v1212_v7 = vsel %vm3305_vm2, %v1201_v55, %v1211_v5 }
 0x5ef   :  { %v1218_v8 = vadd.f32 %v1212_v7, %v1168_v1 }
 0x5f1   :  { %v1155_v48 = vpop.xlane.xlu2 %1154  ;;  %v1529_v6 = vpop.xlane.xlu0 %1528  ;;  %v1220_v63 = vsel %vm3306_vm3, %v1218_v8, -1e+30 }
 0x5f2   :  { %v1164_v2 = vpop.xlane.xlu1 %1163  ;;  %v1178_v19 = vmul.f32 0.4, %v1155_v48  ;;  %v1222_v20 = vsel %vm447_vm7, %v1220_v63, -inf  ;;  %v1554_v56 = vmul.f32 0.4, %v1529_v6 }
 0x5f3   :  { %v1181_v29 = vmul.f32 0.4, %v1164_v2  ;;  %1223 = vmax.xlane.f32.xlu0 %v1222_v20 }
 0x5f4   :  { %v1202_v16 = vperm.slane %v1178_v19, %v2819_v14  ;;  %v1592_v32 = vperm.slane %v1554_v56, %v2819_v14 }
 0x5f5   :  { %v1205_v52 = vperm.slane %v1181_v29, %v2819_v14 }
 0x5f6   :  { %v1213_v35 = vsel %vm422_vm14, %v1203_v3, %v1202_v16  ;;  %vm3307_vm14 = vmmov %vm3302_vm10  ;;  %v1594_v54 = vsel %vm810_vm12, %v1593_v49, %v1592_v32  ;;  %vm3313_vm10 = vcmp.gt.f32.partialorder %v2773_v57, 0.0 }
 0x5f7   :  { %v1214_v41 = vsel %vm424_vm15, %v1204_v58, %v1213_v35  ;;  %v1601_v51 = vsel %vm3307_vm14, %v1588_v10, %v3099_v40  ;;  %vm3308_vm15 = vcmp.gt.f32.partialorder %v2854_v18, 0.0 }
 0x5f8   :  { %v1215_v45 = vsel %vm426_vm0, %v1205_v52, %v1214_v41  ;;  %vm3309_vm0 = vcmask 60416   ;;  %v1602_v30 = vsel %vm3310_vm4, %v1591_v38, %v1601_v51 }
 0x5f9   :  { %v1538_v44 = vpop.xlane.xlu2 %1537  ;;  %v1535_v50 = vpop.xlane.xlu0 %1534  ;;  %v1219_v47 = vadd.f32 %v1215_v45, %v1169_v34  ;;  %v1603_v62 = vsel %vm3311_vm6, %v1594_v54, %v1602_v30 }
 0x5fa   :  { %v1315_v4 = vpop.xlane.xlu1 %1314  ;;  %v1557_v53 = vmul.f32 0.4, %v1538_v44  ;;  %v1556_v0 = vmul.f32 0.4, %v1535_v50 }
 0x5fb   :  { %v1540_v26 = vadd.f32 %v1539_v46, %v1315_v4  ;;  %v1221_v22 = vsel %vm3308_vm15, %v1219_v47, -1e+30 }
 0x5fc   :  { %v1596_v60 = vperm.slane %v1557_v53, %v2866_v25  ;;  %v1595_v11 = vperm.slane %v1556_v0, %v2819_v14  ;;  %v1225_v61 = vsel %vm3309_vm0, %v1221_v22, -inf }
 0x5fd   :  { %1226 = vmax.xlane.f32.xlu2 %v1225_v61  ;;  %v1541_v43 = vmul.f32 0.6, %v1540_v26 }
 0x5fe   :  { %v1597_v40 = vsel %vm810_vm12, %v1596_v60, %v1595_v11  ;;  %vm3314_vm12 = vmmov %vm3309_vm0 }
 0x5ff   :  { %v1604_v55 = vsel %vm3312_vm8, %v1597_v40, %v1603_v62 }
 0x600   :  { %v1606_v1 = vadd.f32 %v1604_v55, %v1541_v43 }
 0x602   :  { %v1607_v5 = vsel %vm3313_vm10, %v1606_v1, -1e+30 }
 0x603   :  { %v1608_v25 = vsel %vm844_vm13, %v1607_v5, -inf }
 0x604   :  { %1609 = vmax.xlane.f32.xlu1 %v1608_v25 }
 0x666   :  { %v1224_v14 = vpop.xlane.xlu0 %1223 }
 0x667   :  { %v1228_v7 = vsub.f32 %v1220_v63, %v1224_v14 }
 0x669   :  { %v1230_v8 = vmul.f32 1.442695, %v1228_v7 }
 0x66b   :  { %2484 = vpow2.f32 %v1230_v8 }
 0x670   :  { %v1227_v12 = vpop.xlane.xlu2 %1226 }
 0x671   :  { %v2485_v9 = vpop.eup %2484  ;;  %v1229_v59 = vsub.f32 %v1221_v22, %v1227_v12 }
 0x672   :  { %v1234_v48 = vmul.f32 %v2485_v9, %v2837_v24 }
 0x673   :  { %v1232_v6 = vmul.f32 1.442695, %v1229_v59 }
 0x674   :  { %v1236_v28 = vsel %vm447_vm7, %v1234_v48, 0.0 }
 0x675   :  { %2486 = vpow2.f32 %v1232_v6  ;;  %1237 = vadd.xlane.f32.xlu0 %v1236_v28  ;;  %v105_v6 = vld [vmem:[#allocation2 + $0x58] sm:$0xff] }
 0x676   :  { %2157 = vmatpush.msrb.mxu3 %v105_v6 }
 0x677   :  { %v1610_v2 = vpop.xlane.xlu1 %1609 }
 0x678   :  { %v1611_v19 = vsub.f32 %v1607_v5, %v1610_v2 }
 0x67a   :  { %v1612_v20 = vmul.f32 1.442695, %v1611_v19 }
 0x67b   :  { %v2487_v21 = vpop.eup %2486 }
 0x67c   :  { %2488 = vpow2.f32 %v1612_v20  ;;  %v3155_v23 = vmul.f32 %v2487_v21, %v2854_v18  ;;  %v2497_v18 = vld [vmem:[%s3288_s0] sm:$0xff] }
 0x67d   :  { %v1664_v17 = vperm.slane %v2497_v18, 4  ;;  %v1668_v3 = vperm.slane %v2497_v18, 5 }
 0x67e   :  { %v1239_v63 = vsel %vm3314_vm12, %v3155_v23, 0.0 }
 0x67f   :  { %1240 = vadd.xlane.f32.xlu2 %v1239_v63  ;;  %vm1665_vm11 = vcmp.eq.s32.totalorder %v1664_v17, %v2605_v15  ;;  %vm1669_vm5 = vcmp.eq.s32.totalorder %v1668_v3, %v2605_v15  ;;  %vm1670_vm2 = vcmp.eq.s32.totalorder %v1668_v3, %v2637_v31  ;;  %v102_v63 = vld [vmem:[#allocation2 + $0x10] sm:$0xff] }
 0x682   :  { %v2489_v29 = vpop.eup %2488 }
 0x683   :  { %v3160_v24 = vmul.f32 %v2489_v29, %v2773_v57  ;;  %v2533_v57 = vmov 0.0   ;;  %v103_v29 = vld [vmem:[#allocation2 + $0x28] sm:$0xff] }
 0x684   :  { %v2365_v16 = vsel %vm1665_vm11, 1.0, %v2533_v57  ;;  %v2366_v27 = vsel %vm1669_vm5, 1.0, %v2533_v57  ;;  %v2367_v58 = vsel %vm1670_vm2, 1.0, %v2533_v57 }
 0x685   :  { %v1615_v56 = vsel %vm844_vm13, %v3160_v24, 0.0 }
 0x686   :  { %1616 = vadd.xlane.f32.xlu1 %v1615_v56 }
 0x689   :  { %1276 = vrot.lane.b32.xlu0 %v2926_v33, %s2530_s7 }
 0x697   :  { %1636 = vrot.lane.b32.xlu2 %v2926_v33, %s2529_s30 }
 0x6ab   :  { %1820 = vxpose.xlu0.b32.start [1/2] (short) %v2366_v27, 128 }
 0x6b3   :  { %1821 = vxpose.xlu0.b32.end [2/2] (short) %v2367_v58, 128 }
 0x6c0   :  { %1675 = vxpose.xlu1.b32.start.end [1/1] (short) %v2365_v16, 128 }
 0x6e8   :  { %v1238_v33 = vpop.xlane.xlu0 %1237 }
 0x6e9   :  { %vm1242_vm3 = vcmp.gt.f32.partialorder %v1238_v33, 0.0 }
 0x6ea   :  { %v1244_v36 = vsel %vm1242_vm3, %v1238_v33, 1.0 }
 0x6eb   :  { %2490 = vrcp.f32 %v1244_v36  ;;  %v1257_v15 = vand.u32 2147483648, %v1244_v36  ;;  %v1255_v32 = vand.u32 2147483647, %v1244_v36  ;;  %vm1251_vm0 = vweird.f32 %v1244_v36 }
 0x6ed   :  { %v1258_v31 = vor.u32 1.1754944e-38, %v1257_v15  ;;  %vm1256_vm6 = vcmp.eq.f32.partialorder %v1255_v32, 8.507059e+37 }
 0x6f1   :  { %v2491_v37 = vpop.eup %2490 }
 0x6f2   :  { %v1247_v13 = vmul.f32 %v2491_v37, %v1244_v36  ;;  %v1241_v52 = vpop.xlane.xlu2 %1240  ;;  %vm1252_vm15 = vweird.f32 %v2491_v37 }
 0x6f3   :  { %vm1243_vm14 = vcmp.gt.f32.partialorder %v1241_v52, 0.0  ;;  %vm1253_vm4 = vmor %vm1251_vm0, %vm1252_vm15 }
 0x6f4   :  { %v1248_v35 = vsub.f32 1.0, %v1247_v13  ;;  %v1245_v39 = vsel %vm1243_vm14, %v1241_v52, 1.0 }
 0x6f5   :  { %2492 = vrcp.f32 %v1245_v39  ;;  %v1272_v38 = vand.u32 2147483648, %v1245_v39  ;;  %v1270_v4 = vand.u32 2147483647, %v1245_v39  ;;  %vm1266_vm12 = vweird.f32 %v1245_v39 }
 0x6f6   :  { %v1249_v34 = vmul.f32 %v2491_v37, %v1248_v35 }
 0x6f7   :  { %v1273_v54 = vor.u32 1.1754944e-38, %v1272_v38  ;;  %vm1271_vm5 = vcmp.eq.f32.partialorder %v1270_v4, 8.507059e+37 }
 0x6f8   :  { %v1250_v41 = vadd.f32 %v2491_v37, %v1249_v34 }
 0x6f9   :  { %v1617_v42 = vpop.xlane.xlu1 %1616 }
 0x6fa   :  { %v1254_v45 = vsel %vm1253_vm4, %v2491_v37, %v1250_v41  ;;  %vm1618_vm8 = vcmp.gt.f32.partialorder %v1617_v42, 0.0  ;;  %v1637_v56 = vpop.permute.xlu2 %1636 }
 0x6fb   :  { %v2493_v46 = vpop.eup %2492  ;;  %v1259_v10 = vsel %vm1256_vm6, %v1258_v31, %v1254_v45  ;;  %v1619_v49 = vsel %vm1618_vm8, %v1617_v42, 1.0  ;;  %v1277_v14 = vpop.permute.xlu0 %1276 }
 0x6fc   :  { %v1260_v44 = vmul.f32 %v1259_v10, %v1234_v48  ;;  %v1262_v50 = vmul.f32 %v2493_v46, %v1245_v39  ;;  %2494 = vrcp.f32 %v1619_v49  ;;  %vm1267_vm10 = vweird.f32 %v2493_v46  ;;  %v104_v48 = vld [vmem:[#allocation2 + $0x40] sm:$0xff] }
 0x6fd   :  { %vm1268_vm11 = vmor %vm1266_vm12, %vm1267_vm10  ;;  %v1631_v61 = vand.u32 2147483648, %v1619_v49  ;;  %v1629_v40 = vand.u32 2147483647, %v1619_v49  ;;  %vm1625_vm3 = vweird.f32 %v1619_v49  ;;  %v2460_v28 = vpack.i.bf16 %v104_v48, %v105_v6  ;;  %2158 = vmatpush.msrb.mxu3 %v104_v48 }
 0x6fe   :  { %v1263_v47 = vsub.f32 1.0, %v1262_v50  ;;  %2358 = vmatmul.msk.f32.vlgmr.msra.gmra.mxu3 %vm447_vm7, %v1260_v44 }
 0x6ff   :  { %v1632_v55 = vor.u32 1.1754944e-38, %v1631_v61  ;;  %vm1630_vm15 = vcmp.eq.f32.partialorder %v1629_v40, 8.507059e+37  ;;  %2461 = vrot.lane.b32.xlu2 %v2460_v28, %s2531_s8  ;;  %2159 = vmatpush.msrb.mxu3 %v103_v29 }
 0x700   :  { %v1264_v51 = vmul.f32 %v2493_v46, %v1263_v47 }
 0x701   :  { %2160 = vmatpush.msrb.mxu3 %v102_v63 }
 0x702   :  { %v2495_v53 = vpop.eup %2494  ;;  %v1265_v0 = vadd.f32 %v2493_v46, %v1264_v51 }
 0x703   :  { %v1621_v26 = vmul.f32 %v2495_v53, %v1619_v49  ;;  %vm1626_vm2 = vweird.f32 %v2495_v53 }
 0x704   :  { %v1269_v22 = vsel %vm1268_vm11, %v2493_v46, %v1265_v0  ;;  %vm1627_vm14 = vmor %vm1625_vm3, %vm1626_vm2 }
 0x705   :  { %v1622_v60 = vsub.f32 1.0, %v1621_v26  ;;  %v1274_v11 = vsel %vm1271_vm5, %v1273_v54, %v1269_v22 }
 0x706   :  { %v1275_v30 = vmul.f32 %v1274_v11, %v3155_v23 }
 0x707   :  { %v1623_v43 = vmul.f32 %v2495_v53, %v1622_v60 }
 0x708   :  { %2359 = vmatmul.msk.f32.gmra.mxu3 %vm447_vm7, %v1275_v30 }
 0x709   :  { %v1624_v62 = vadd.f32 %v2495_v53, %v1623_v43 }
 0x70b   :  { %v1628_v1 = vsel %vm1627_vm14, %v2495_v53, %v1624_v62 }
 0x70c   :  { %v1633_v5 = vsel %vm1630_vm15, %v1632_v55, %v1628_v1 }
 0x70d   :  { %v1634_v25 = vmul.f32 %v1633_v5, %v3160_v24  ;;  %v2465_v24 = vpack.i.bf16 %v102_v63, %v103_v29 }
 0x70f   :  { %2364 = vmatmul.msk.f32.vlgmr.msra.gmra.mxu2 %vm844_vm13, %v1634_v25  ;;  %2466 = vrot.lane.b32.xlu2 %v2465_v24, %s2531_s8 }
 0x74f   :  { %v1836_v8 = vpop.trf.xlu0 }
 0x757   :  { %v1837_v59 = vpop.trf.xlu0 }
 0x759   :  { %v2462_v45 = vpop.permute.xlu2 %2461 }
 0x75a   :  { %v2464_v46 = vunpack.i.h.bf16 %v2462_v45  ;;  %v2463_v10 = vunpack.i.l.bf16 %v2462_v45 }
 0x75c   :  { %2044 = vmatpush.msrb.mxu2 %v2463_v10 }
 0x75e   :  { %2045 = vmatpush.msrb.mxu2 %v2464_v46 }
 0x75f   :  { %v1838_v21 = vpop.trf.xlu0 }
 0x764   :  { %v1691_v7 = vpop.trf.xlu1 }
 0x767   :  { %v1839_v57 = vpop.trf.xlu0 }
 0x769   :  { %v2467_v44 = vpop.permute.xlu2 %2466 }
 0x76a   :  { %v2469_v50 = vunpack.i.h.bf16 %v2467_v44  ;;  %v2468_v47 = vunpack.i.l.bf16 %v2467_v44 }
 0x76c   :  { %v1692_v9 = vpop.trf.xlu1  ;;  %2046 = vmatpush.msrb.mxu2 %v2468_v47 }
 0x76e   :  { %2047 = vmatpush.msrb.mxu2 %v2469_v50 }
 0x76f   :  { %v1840_v16 = vpop.trf.xlu0 }
 0x774   :  { %v1693_v20 = vpop.trf.xlu1 }
 0x777   :  { %v1841_v58 = vpop.trf.xlu0 }
 0x77c   :  { %v1694_v3 = vpop.trf.xlu1 }
 0x77f   :  { %v1842_v36 = vpop.trf.xlu0 }
 0x781   :  { %v1302_v12 = vpop.f32.mrf.mxu3 }
 0x782   :  { %v1303_v23 = vadd.f32 %v1302_v12, %v1277_v14 }
 0x784   :  { %v1695_v27 = vpop.trf.xlu1 }
 0x787   :  { %v1843_v13 = vpop.trf.xlu0 }
 0x78b   :  { %v1305_v2 = vpop.f32.mrf.mxu3 }
 0x78c   :  { %v1306_v19 = vadd.f32 %v1305_v2, %v1277_v14  ;;  %v1696_v33 = vpop.trf.xlu1 }
 0x78e   :  { %2384 = vmatpush.msk.msrb.mxu1 %vm880_vm9, %v1306_v19 }
 0x78f   :  { %v1844_v35 = vpop.trf.xlu0 }
 0x790   :  { %1918 = vmatpush.msrb.mxu1 %v1303_v23 }
 0x791   :  { %2385 = vmatmul.msk.f32.vlgmr.msrb.gmra.mxu1 %vm844_vm13, %v1836_v8 }
 0x792   :  { %v1661_v18 = vpop.f32.mrf.mxu2 }
 0x793   :  { %v1662_v17 = vadd.f32 %v1661_v18, %v1637_v56 }
 0x794   :  { %v1697_v37 = vpop.trf.xlu1 }
 0x795   :  { %1770 = vmatpush.msrb.mxu0 %v1662_v17 }
 0x796   :  { %2368 = vmatmul.msk.f32.vlgmr.msrb.gmra.mxu0 %vm447_vm7, %v1691_v7 }
 0x797   :  { %v1845_v15 = vpop.trf.xlu0 }
 0x799   :  { %2386 = vmatmul.msk.f32.gmra.mxu1 %vm844_vm13, %v1837_v59 }
 0x79c   :  { %v1698_v52 = vpop.trf.xlu1 }
 0x79e   :  { %2369 = vmatmul.msk.f32.gmra.mxu0 %vm447_vm7, %v1692_v9 }
 0x79f   :  { %v1846_v32 = vpop.trf.xlu0 }
 0x7a1   :  { %2387 = vmatmul.msk.f32.gmra.mxu1 %vm844_vm13, %v1838_v21 }
 0x7a4   :  { %v1699_v39 = vpop.trf.xlu1 }
 0x7a6   :  { %2370 = vmatmul.msk.f32.gmra.mxu0 %vm447_vm7, %v1693_v20 }
 0x7a7   :  { %v1847_v31 = vpop.trf.xlu0 }
 0x7a9   :  { %2388 = vmatmul.msk.f32.gmra.mxu1 %vm844_vm13, %v1839_v57 }
 0x7ac   :  { %v1700_v34 = vpop.trf.xlu1 }
 0x7ae   :  { %2371 = vmatmul.msk.f32.gmra.mxu0 %vm447_vm7, %v1694_v3 }
 0x7af   :  { %v1848_v49 = vpop.trf.xlu0 }
 0x7b1   :  { %2389 = vmatmul.msk.f32.gmra.mxu1 %vm844_vm13, %v1840_v16 }
 0x7b4   :  { %v1701_v41 = vpop.trf.xlu1 }
 0x7b6   :  { %2372 = vmatmul.msk.f32.gmra.mxu0 %vm447_vm7, %v1695_v27 }
 0x7b7   :  { %v1849_v51 = vpop.trf.xlu0 }
 0x7b9   :  { %2390 = vmatmul.msk.f32.gmra.mxu1 %vm844_vm13, %v1841_v58 }
 0x7bc   :  { %v1702_v42 = vpop.trf.xlu1 }
 0x7be   :  { %2373 = vmatmul.msk.f32.gmra.mxu0 %vm447_vm7, %v1696_v33 }
 0x7bf   :  { %v1850_v53 = vpop.trf.xlu0 }
 0x7c1   :  { %2391 = vmatmul.msk.f32.gmra.mxu1 %vm844_vm13, %v1842_v36 }
 0x7c4   :  { %v1703_v38 = vpop.trf.xlu1 }
 0x7c6   :  { %2374 = vmatmul.msk.f32.gmra.mxu0 %vm447_vm7, %v1697_v37 }
 0x7c7   :  { %v1851_v54 = vpop.trf.xlu0 }
 0x7c9   :  { %2392 = vmatmul.msk.f32.gmra.mxu1 %vm844_vm13, %v1843_v13 }
 0x7cc   :  { %v1704_v4 = vpop.trf.xlu1 }
 0x7ce   :  { %2375 = vmatmul.msk.f32.gmra.mxu0 %vm447_vm7, %v1698_v52 }
 0x7d1   :  { %2393 = vmatmul.msk.f32.gmra.mxu1 %vm844_vm13, %v1844_v35 }
 0x7d4   :  { %v1705_v0 = vpop.trf.xlu1 }
 0x7d6   :  { %2376 = vmatmul.msk.f32.gmra.mxu0 %vm447_vm7, %v1699_v39 }
 0x7d9   :  { %2394 = vmatmul.msk.f32.gmra.mxu1 %vm844_vm13, %v1845_v15 }
 0x7dc   :  { %v1706_v26 = vpop.trf.xlu1 }
 0x7de   :  { %2377 = vmatmul.msk.f32.gmra.mxu0 %vm447_vm7, %v1700_v34 }
 0x7e1   :  { %2395 = vmatmul.msk.f32.gmra.mxu1 %vm844_vm13, %v1846_v32 }
 0x7e6   :  { %2378 = vmatmul.msk.f32.gmra.mxu0 %vm447_vm7, %v1701_v41 }
 0x7e9   :  { %2396 = vmatmul.msk.f32.gmra.mxu1 %vm844_vm13, %v1847_v31 }
 0x7ee   :  { %2379 = vmatmul.msk.f32.gmra.mxu0 %vm447_vm7, %v1702_v42 }
 0x7f1   :  { %2397 = vmatmul.msk.f32.gmra.mxu1 %vm844_vm13, %v1848_v49 }
 0x7f6   :  { %2380 = vmatmul.msk.f32.gmra.mxu0 %vm447_vm7, %v1703_v38 }
 0x7f9   :  { %2398 = vmatmul.msk.f32.gmra.mxu1 %vm844_vm13, %v1849_v51 }
 0x7fe   :  { %2381 = vmatmul.msk.f32.gmra.mxu0 %vm447_vm7, %v1704_v4 }
 0x801   :  { %2399 = vmatmul.msk.f32.gmra.mxu1 %vm844_vm13, %v1850_v53 }
 0x806   :  { %2382 = vmatmul.msk.f32.gmra.mxu0 %vm447_vm7, %v1705_v0  ;;  %v2498_v0 = vld [vmem:[%s3292_s4] sm:$0xff] }
 0x809   :  { %2400 = vmatmul.msk.f32.gmra.mxu1 %vm844_vm13, %v1851_v54  ;;  %v2246_v54 = vrot.slane %v2498_v0, 4 }
 0x80b   :  { %2247 = vrot.lane.b32.xlu2 %v2246_v54, %s2531_s8 }
 0x80e   :  { %2383 = vmatmul.msk.f32.gmra.mxu0 %vm447_vm7, %v1706_v26  ;;  %v1920_v22 = vpop.f32.mrf.mxu1 }
 0x80f   :  { %2401 = vmatmul.msk.f32.vlgmr.msrb.gmra.mxu2 %vm111_vm1, %v1920_v22 }
 0x813   :  { %v1772_v60 = vpop.f32.mrf.mxu0 }
 0x814   :  { %2417 = vmatmul.msk.f32.vlgmr.msrb.gmra.mxu3 %vm111_vm1, %v1772_v60 }
 0x816   :  { %v1923_v11 = vpop.f32.mrf.mxu1 }
 0x817   :  { %2402 = vmatmul.msk.f32.gmra.mxu2 %vm111_vm1, %v1923_v11 }
 0x81b   :  { %v1775_v61 = vpop.f32.mrf.mxu0 }
 0x81c   :  { %2418 = vmatmul.msk.f32.gmra.mxu3 %vm111_vm1, %v1775_v61 }
 0x81e   :  { %v1926_v30 = vpop.f32.mrf.mxu1 }
 0x81f   :  { %2403 = vmatmul.msk.f32.gmra.mxu2 %vm111_vm1, %v1926_v30 }
 0x823   :  { %v1778_v43 = vpop.f32.mrf.mxu0 }
 0x824   :  { %2419 = vmatmul.msk.f32.gmra.mxu3 %vm111_vm1, %v1778_v43 }
 0x826   :  { %v1929_v40 = vpop.f32.mrf.mxu1 }
 0x827   :  { %2404 = vmatmul.msk.f32.gmra.mxu2 %vm111_vm1, %v1929_v40 }
 0x82b   :  { %v1781_v62 = vpop.f32.mrf.mxu0 }
 0x82c   :  { %2420 = vmatmul.msk.f32.gmra.mxu3 %vm111_vm1, %v1781_v62 }
 0x82e   :  { %v1932_v55 = vpop.f32.mrf.mxu1 }
 0x82f   :  { %2405 = vmatmul.msk.f32.gmra.mxu2 %vm111_vm1, %v1932_v55 }
 0x833   :  { %v1784_v1 = vpop.f32.mrf.mxu0 }
 0x834   :  { %2421 = vmatmul.msk.f32.gmra.mxu3 %vm111_vm1, %v1784_v1 }
 0x836   :  { %v1935_v5 = vpop.f32.mrf.mxu1 }
 0x837   :  { %2406 = vmatmul.msk.f32.gmra.mxu2 %vm111_vm1, %v1935_v5 }
 0x83b   :  { %v1787_v25 = vpop.f32.mrf.mxu0 }
 0x83c   :  { %2422 = vmatmul.msk.f32.gmra.mxu3 %vm111_vm1, %v1787_v25 }
 0x83e   :  { %v1938_v14 = vpop.f32.mrf.mxu1 }
 0x83f   :  { %2407 = vmatmul.msk.f32.gmra.mxu2 %vm111_vm1, %v1938_v14  ;;  %v2210_v14 = vperm.slane %v2498_v0, 4 }
 0x843   :  { %v1790_v7 = vpop.f32.mrf.mxu0 }
 0x844   :  { %2423 = vmatmul.msk.f32.gmra.mxu3 %vm111_vm1, %v1790_v7 }
 0x846   :  { %v1941_v8 = vpop.f32.mrf.mxu1 }
 0x847   :  { %2408 = vmatmul.msk.f32.gmra.mxu2 %vm111_vm1, %v1941_v8 }
 0x84b   :  { %v1793_v12 = vpop.f32.mrf.mxu0 }
 0x84c   :  { %2424 = vmatmul.msk.f32.gmra.mxu3 %vm111_vm1, %v1793_v12 }
 0x84e   :  { %v1944_v9 = vpop.f32.mrf.mxu1 }
 0x84f   :  { %2409 = vmatmul.msk.f32.gmra.mxu2 %vm111_vm1, %v1944_v9 }
 0x853   :  { %v1796_v59 = vpop.f32.mrf.mxu0 }
 0x854   :  { %2425 = vmatmul.msk.f32.gmra.mxu3 %vm111_vm1, %v1796_v59 }
 0x856   :  { %v1947_v48 = vpop.f32.mrf.mxu1 }
 0x857   :  { %2410 = vmatmul.msk.f32.gmra.mxu2 %vm111_vm1, %v1947_v48 }
 0x85b   :  { %v1799_v6 = vpop.f32.mrf.mxu0 }
 0x85c   :  { %2426 = vmatmul.msk.f32.gmra.mxu3 %vm111_vm1, %v1799_v6 }
 0x85e   :  { %v1950_v28 = vpop.f32.mrf.mxu1 }
 0x85f   :  { %2411 = vmatmul.msk.f32.gmra.mxu2 %vm111_vm1, %v1950_v28 }
 0x863   :  { %v1802_v2 = vpop.f32.mrf.mxu0 }
 0x864   :  { %2427 = vmatmul.msk.f32.gmra.mxu3 %vm111_vm1, %v1802_v2 }
 0x866   :  { %v1953_v19 = vpop.f32.mrf.mxu1 }
 0x867   :  { %2412 = vmatmul.msk.f32.gmra.mxu2 %vm111_vm1, %v1953_v19 }
 0x86b   :  { %v1805_v20 = vpop.f32.mrf.mxu0 }
 0x86c   :  { %2428 = vmatmul.msk.f32.gmra.mxu3 %vm111_vm1, %v1805_v20 }
 0x86e   :  { %v1956_v21 = vpop.f32.mrf.mxu1 }
 0x86f   :  { %2413 = vmatmul.msk.f32.gmra.mxu2 %vm111_vm1, %v1956_v21 }
 0x873   :  { %v1808_v23 = vpop.f32.mrf.mxu0 }
 0x874   :  { %2429 = vmatmul.msk.f32.gmra.mxu3 %vm111_vm1, %v1808_v23 }
 0x876   :  { %v1959_v63 = vpop.f32.mrf.mxu1 }
 0x877   :  { %2414 = vmatmul.msk.f32.gmra.mxu2 %vm111_vm1, %v1959_v63 }
 0x87b   :  { %v1811_v29 = vpop.f32.mrf.mxu0 }
 0x87c   :  { %2430 = vmatmul.msk.f32.gmra.mxu3 %vm111_vm1, %v1811_v29 }
 0x87e   :  { %v1962_v24 = vpop.f32.mrf.mxu1 }
 0x87f   :  { %2415 = vmatmul.msk.f32.gmra.mxu2 %vm111_vm1, %v1962_v24 }
 0x883   :  { %v1814_v56 = vpop.f32.mrf.mxu0 }
 0x884   :  { %2431 = vmatmul.msk.f32.gmra.mxu3 %vm111_vm1, %v1814_v56 }
 0x886   :  { %v1965_v18 = vpop.f32.mrf.mxu1 }
 0x887   :  { %2416 = vmatmul.msk.f32.gmra.mxu2 %vm111_vm1, %v1965_v18 }
 0x88b   :  { %v1817_v17 = vpop.f32.mrf.mxu0 }
 0x88c   :  { %2432 = vmatmul.msk.f32.gmra.mxu3 %vm111_vm1, %v1817_v17 }
 0x892   :  { %v2049_v3 = vpop.f32.mrf.mxu2 }
 0x897   :  { %v2162_v57 = vpop.f32.mrf.mxu3 }
 0x898   :  { %v3246_v16 = vadd.f32 %v2162_v57, %v2049_v3 }
 0x89a   :  { %v2052_v27 = vpop.f32.mrf.mxu2 }
 0x89f   :  { %v2165_v58 = vpop.f32.mrf.mxu3 }
 0x8a0   :  { %v3248_v33 = vadd.f32 %v2165_v58, %v2052_v27 }
 0x8a2   :  { %v2055_v36 = vpop.f32.mrf.mxu2 }
 0x8a7   :  { %v2168_v37 = vpop.f32.mrf.mxu3 }
 0x8a8   :  { %v3250_v13 = vadd.f32 %v2168_v37, %v2055_v36 }
 0x8aa   :  { %v2058_v52 = vpop.f32.mrf.mxu2 }
 0x8af   :  { %v2171_v35 = vpop.f32.mrf.mxu3 }
 0x8b0   :  { %v3252_v39 = vadd.f32 %v2171_v35, %v2058_v52  ;;  %v2534_v52 = vmov 64  }
 0x8b1   :  { %2470 = vset.pattern.permute.xlu2 %v2534_v52  ;;  %2471 = vset.pattern.permute.xlu0 %v2534_v52 }
 0x8b2   :  { %v2061_v15 = vpop.f32.mrf.mxu2  ;;  %2244 = vperm.xlu2 %2470, %v2498_v0  }
 0x8b7   :  { %v2174_v34 = vpop.f32.mrf.mxu3 }
 0x8b8   :  { %v3254_v32 = vadd.f32 %v2174_v34, %v2061_v15 }
 0x8ba   :  { %v2064_v41 = vpop.f32.mrf.mxu2  ;;  %v2215_v34 = vadd.f32 %v2210_v14, %v3254_v32  ;;  %v2211_v32 = vadd.f32 %v2210_v14, %v3246_v16 }
 0x8bf   :  { %v2177_v31 = vpop.f32.mrf.mxu3 }
 0x8c0   :  { %v3256_v42 = vadd.f32 %v2177_v31, %v2064_v41  ;;  %v2214_v31 = vadd.f32 %v2210_v14, %v3252_v39  ;;  %v2248_v39 = vpop.permute.xlu2 %2247 }
 0x8c2   :  { %v2067_v45 = vpop.f32.mrf.mxu2  ;;  %v2216_v35 = vadd.f32 %v2210_v14, %v3256_v42  ;;  %v2212_v42 = vadd.f32 %v2210_v14, %v3248_v33 }
 0x8c4   :  { %v2232_v41 = vmax.f32 %v2216_v35, 0.0 }
 0x8c7   :  { %v2180_v46 = vpop.f32.mrf.mxu3 }
 0x8c8   :  { %v2181_v10 = vadd.f32 %v2180_v46, %v2067_v45  ;;  %v2231_v45 = vmax.f32 %v2215_v34, 0.0  ;;  %v2213_v46 = vadd.f32 %v2210_v14, %v3250_v13 }
 0x8ca   :  { %v2070_v49 = vpop.f32.mrf.mxu2  ;;  %v2217_v36 = vadd.f32 %v2210_v14, %v2181_v10  ;;  %v2230_v10 = vmax.f32 %v2214_v31, 0.0 }
 0x8cc   :  { %v2233_v15 = vmax.f32 %v2217_v36, 0.0 }
 0x8cf   :  { %v2183_v44 = vpop.f32.mrf.mxu3 }
 0x8d0   :  { %v2184_v50 = vadd.f32 %v2183_v44, %v2070_v49  ;;  %v2229_v49 = vmax.f32 %v2213_v46, 0.0  ;;  %v2228_v44 = vmax.f32 %v2212_v42, 0.0 }
 0x8d2   :  { %v2073_v47 = vpop.f32.mrf.mxu2  ;;  %v2218_v27 = vadd.f32 %v2210_v14, %v2184_v50  ;;  %v2227_v50 = vmax.f32 %v2211_v32, 0.0 }
 0x8d4   :  { %v2234_v37 = vmax.f32 %v2218_v27, 0.0 }
 0x8d7   :  { %v2186_v38 = vpop.f32.mrf.mxu3 }
 0x8d8   :  { %v2187_v51 = vadd.f32 %v2186_v38, %v2073_v47 }
 0x8da   :  { %v2076_v4 = vpop.f32.mrf.mxu2  ;;  %v2219_v3 = vadd.f32 %v2210_v14, %v2187_v51 }
 0x8dc   :  { %v2235_v58 = vmax.f32 %v2219_v3, 0.0 }
 0x8df   :  { %v2189_v53 = vpop.f32.mrf.mxu3 }
 0x8e0   :  { %v2190_v26 = vadd.f32 %v2189_v53, %v2076_v4 }
 0x8e2   :  { %v2079_v22 = vpop.f32.mrf.mxu2  ;;  %v2220_v18 = vadd.f32 %v2210_v14, %v2190_v26 }
 0x8e4   :  { %v2236_v57 = vmax.f32 %v2220_v18, 0.0 }
 0x8e7   :  { %v2192_v60 = vpop.f32.mrf.mxu3 }
 0x8e8   :  { %v2193_v23 = vadd.f32 %v2192_v60, %v2079_v22 }
 0x8ea   :  { %v2082_v11 = vpop.f32.mrf.mxu2  ;;  %v2221_v24 = vadd.f32 %v2210_v14, %v2193_v23 }
 0x8ec   :  { %v2237_v17 = vmax.f32 %v2221_v24, 0.0 }
 0x8ef   :  { %v2195_v61 = vpop.f32.mrf.mxu3 }
 0x8f0   :  { %v2196_v19 = vadd.f32 %v2195_v61, %v2082_v11 }
 0x8f2   :  { %v2085_v30 = vpop.f32.mrf.mxu2  ;;  %v2222_v63 = vadd.f32 %v2210_v14, %v2196_v19 }
 0x8f4   :  { %v2238_v56 = vmax.f32 %v2222_v63, 0.0 }
 0x8f7   :  { %v2198_v43 = vpop.f32.mrf.mxu3 }
 0x8f8   :  { %v2199_v6 = vadd.f32 %v2198_v43, %v2085_v30 }
 0x8fa   :  { %v2088_v40 = vpop.f32.mrf.mxu2  ;;  %v2223_v20 = vadd.f32 %v2210_v14, %v2199_v6 }
 0x8fc   :  { %v2239_v29 = vmax.f32 %v2223_v20, 0.0 }
 0x8ff   :  { %v2201_v62 = vpop.f32.mrf.mxu3 }
 0x900   :  { %v2202_v9 = vadd.f32 %v2201_v62, %v2088_v40 }
 0x902   :  { %v2091_v55 = vpop.f32.mrf.mxu2  ;;  %v2224_v28 = vadd.f32 %v2210_v14, %v2202_v9 }
 0x904   :  { %v2240_v21 = vmax.f32 %v2224_v28, 0.0 }
 0x907   :  { %v2204_v1 = vpop.f32.mrf.mxu3 }
 0x908   :  { %v2205_v7 = vadd.f32 %v2204_v1, %v2091_v55 }
 0x90a   :  { %v2094_v5 = vpop.f32.mrf.mxu2  ;;  %v2225_v59 = vadd.f32 %v2210_v14, %v2205_v7 }
 0x90c   :  { %v2241_v2 = vmax.f32 %v2225_v59, 0.0  ;;  %v2245_v13 = vpop.permute.xlu2 %2244 }
 0x90d   :  { %v2249_v47 = vrot.slane %v2245_v13, 4 }
 0x90f   :  { %v2207_v25 = vpop.f32.mrf.mxu3 }
 0x910   :  { %v2208_v8 = vadd.f32 %v2207_v25, %v2094_v5 }
 0x912   :  { %v2226_v12 = vadd.f32 %v2210_v14, %v2208_v8 }
 0x914   :  { %v2242_v48 = vmax.f32 %v2226_v12, 0.0 }
 0x916   :  { %2433 = vmatpush.xpose.msk.msra.mxu0 %vm111_vm1, %v2242_v48 }
 0x91a   :  { %2434 = vmatpush.xpose.msk.msra.mxu0 %vm111_vm1, %v2241_v2 }
 0x91e   :  { %2435 = vmatpush.xpose.msk.msra.mxu0 %vm111_vm1, %v2240_v21 }
 0x922   :  { %2436 = vmatpush.xpose.msk.msra.mxu0 %vm111_vm1, %v2239_v29 }
 0x926   :  { %2437 = vmatpush.xpose.msk.msra.mxu0 %vm111_vm1, %v2238_v56 }
 0x92a   :  { %2438 = vmatpush.xpose.msk.msra.mxu0 %vm111_vm1, %v2237_v17 }
 0x92e   :  { %2439 = vmatpush.xpose.msk.msra.mxu0 %vm111_vm1, %v2236_v57 }
 0x932   :  { %2440 = vmatpush.xpose.msk.msra.mxu0 %vm111_vm1, %v2235_v58 }
 0x936   :  { %2441 = vmatpush.xpose.msk.msra.mxu0 %vm111_vm1, %v2234_v37 }
 0x93a   :  { %2442 = vmatpush.xpose.msk.msra.mxu0 %vm111_vm1, %v2233_v15 }
 0x93e   :  { %2443 = vmatpush.xpose.msk.msra.mxu0 %vm111_vm1, %v2232_v41 }
 0x942   :  { %2444 = vmatpush.xpose.msk.msra.mxu0 %vm111_vm1, %v2231_v45 }
 0x946   :  { %2445 = vmatpush.xpose.msk.msra.mxu0 %vm111_vm1, %v2230_v10 }
 0x94a   :  { %2446 = vmatpush.xpose.msk.msra.mxu0 %vm111_vm1, %v2229_v49 }
 0x94e   :  { %2447 = vmatpush.xpose.msk.msra.mxu0 %vm111_vm1, %v2228_v44 }
 0x952   :  { %2448 = vmatpush.xpose.msk.msra.mxu0 %vm111_vm1, %v2227_v50 }
 0x955   :  { %2449 = vmatmul.msk.f32.vlgmr.msra.gmra.mxu0 %vm111_vm1, %v2248_v39 }
 0x9d2   :  { %v2318_v38 = vpop.f32.mrf.mxu0 }
 0x9d3   :  { %v2319_v51 = vadd.f32 %v2318_v38, %v2249_v47 }
 0x9d5   :  { %2321 = vst [vmem:[%s3293_s5] sm:$0x1] %v2319_v51 }
 0x9d6   :  { %2326 = vsyncpa [#allocation3], 1 }

</bundles_post_ra>
